<compile_context>
chip_gen: v7x
topology: tpu7x:2x2x1
jax: 0.10.0
libtpu: 0.0.40
codegen_flags: <defaults>
</compile_context>

<pallas_src>
import numpy as np

import jax
import jax.numpy as jnp
from jax.experimental import pallas as pl
from jax.experimental.pallas import tpu as pltpu


def right_branch_kernel(x_ref, halo_ref, w1_ref, c1_ref, wdw_ref, w3_ref, c3_ref,
                        o_ref, h1_ref, acc_ref):
    """Right branch of BasicUnit on one (1, TH, W, Cp) NHWC tile.

    x_ref    : (1, TH, W, Cp)  input tile (right half, channels zero-padded)
    halo_ref : (1, 2, W, Cp)   x rows directly above / below this tile
    w1_ref   : (Cp, Cp)        1x1 conv #1 weight [cin, cout], BN1 scale folded
    c1_ref   : (1, Cp)         BN1 shift (conv1 bias folded)
    wdw_ref  : (9, Cp)         3x3 depthwise taps (tap-major), BN2 scale folded
    w3_ref   : (Cp, Cp)        1x1 conv #2 weight [cin, cout], BN3 scale folded
    c3_ref   : (1, Cp)         BN3 shift + BN2 shift pushed through conv #2
    o_ref    : (1, TH, W, Cp)  output tile
    h1_ref   : (TH+2, W+2, Cp) VMEM staging buffer for h1 + 1-element halo
    acc_ref  : (TH, W, Cp)     VMEM accumulator for the depthwise conv
    """
    _, TH, W, Cp = x_ref.shape
    mdt = w1_ref.dtype          # MXU operand dtype (float32 or bfloat16)

    # ---- 1x1 conv #1 (+ folded BN1 scale) + shift + ReLU: MXU matmul --------
    x2d = x_ref[0].reshape(TH * W, Cp).astype(mdt)
    h1 = jnp.dot(x2d, w1_ref[...], preferred_element_type=jnp.float32)
    h1 = jnp.maximum(h1 + c1_ref[...], 0.0)

    # Same pointwise stage for the two halo rows.
    halo2d = halo_ref[0].reshape(2 * W, Cp).astype(mdt)
    h1h = jnp.dot(halo2d, w1_ref[...], preferred_element_type=jnp.float32)
    h1h = jnp.maximum(h1h + c1_ref[...], 0.0).reshape(2, W, Cp)

    # The depthwise conv zero-pads h1 at image borders: mask halo rows that
    # fall outside the image (first / last H tile of the grid).
    hi = pl.program_id(1)
    top = jnp.where(hi > 0, h1h[0], 0.0)
    bot = jnp.where(hi < pl.num_programs(1) - 1, h1h[1], 0.0)

    # ---- stage h1 (+1 halo row/column) in VMEM -------------------------------
    # Only the two 1-wide halo columns are zeroed; every other element is
    # written exactly once (no full-buffer zero pass).
    zcol = jnp.zeros((TH + 2, 1, Cp), jnp.float32)
    h1_ref[:, 0:1, :] = zcol
    h1_ref[:, W + 1:W + 2, :] = zcol
    h1_ref[0:1, 1:W + 1, :] = top.reshape(1, W, Cp)
    h1_ref[TH + 1:TH + 2, 1:W + 1, :] = bot.reshape(1, W, Cp)
    h1_ref[1:TH + 1, 1:W + 1, :] = h1.reshape(TH, W, Cp)

    # ---- 3x3 depthwise conv, stride 1, pad 1 (BN2 scale folded into taps) ----
    # Accumulate per-dy strip into a VMEM scratch to bound vreg pressure.
    for dy in range(3):
        part = (h1_ref[dy:dy + TH, 0:W, :] * wdw_ref[3 * dy + 0:3 * dy + 1, :]
                + h1_ref[dy:dy + TH, 1:W + 1, :] * wdw_ref[3 * dy + 1:3 * dy + 2, :]
                + h1_ref[dy:dy + TH, 2:W + 2, :] * wdw_ref[3 * dy + 2:3 * dy + 3, :])
        if dy == 0:
            acc_ref[...] = part
        else:
            acc_ref[...] += part

    # ---- 1x1 conv #2 (BN3 scale folded; BN2 shift folded into c3) + ReLU -----
    h2 = acc_ref[...].reshape(TH * W, Cp).astype(mdt)
    h3 = jnp.dot(h2, w3_ref[...], preferred_element_type=jnp.float32)
    h3 = jnp.maximum(h3 + c3_ref[...], 0.0)
    o_ref[...] = h3.reshape(1, TH, W, Cp).astype(o_ref.dtype)


def run_right_branch(xr, halo, w1, c1, wdw, w3, c3, *, tile_h):
    N, H, W, Cp = xr.shape
    nH = H // tile_h

    # Advisory cost hint so XLA schedules the surrounding layout ops sensibly.
    flops = 2 * N * H * W * Cp * (2 * Cp + 9)
    bytes_accessed = 4 * (2 * N * H * W * Cp + int(halo.size)
                          + 2 * Cp * Cp + 11 * Cp)

    return pl.pallas_call(
        right_branch_kernel,
        out_shape=jax.ShapeDtypeStruct((N, H, W, Cp), jnp.float32),
        grid_spec=pltpu.PrefetchScalarGridSpec(
            num_scalar_prefetch=0,
            grid=(N, nH),
            in_specs=[
                pl.BlockSpec((1, tile_h, W, Cp), lambda n, h: (n, h, 0, 0)),
                pl.BlockSpec((1, 2, W, Cp), lambda n, h: (n, h, 0, 0)),
                pl.BlockSpec((Cp, Cp), lambda n, h: (0, 0)),
                pl.BlockSpec((1, Cp), lambda n, h: (0, 0)),
                pl.BlockSpec((9, Cp), lambda n, h: (0, 0)),
                pl.BlockSpec((Cp, Cp), lambda n, h: (0, 0)),
                pl.BlockSpec((1, Cp), lambda n, h: (0, 0)),
            ],
            out_specs=pl.BlockSpec((1, tile_h, W, Cp), lambda n, h: (n, h, 0, 0)),
            scratch_shapes=[
                pltpu.VMEM((tile_h + 2, W + 2, Cp), jnp.float32),  # h1 + halo
                pltpu.VMEM((tile_h, W, Cp), jnp.float32),          # dw accumulator
            ]),
        compiler_params=pltpu.CompilerParams(
            dimension_semantics=("parallel", "parallel"),   # megacore on v7x
            vmem_limit_bytes=32 * 1024 * 1024),              # safe on 64 MiB v7x
        cost_estimate=pl.CostEstimate(flops=flops, transcendentals=0,
                                      bytes_accessed=bytes_accessed),
    )(xr, halo, w1, c1, wdw, w3, c3)


def _pick_tile_h(H):
    """Largest divisor of H that is <= 8 (rows per tile; H axis is not sublane)."""
    for t in range(min(8, H), 0, -1):
        if H % t == 0:
            return t
    return 1


@jax.jit
def basic_unit_forward(x_nchw, params):
    """BasicUnit forward.  x_nchw: (N, C, H, W) float32."""
    N, C, H, W = x_nchw.shape
    Cr = C // 2
    Cp = params['w1'].shape[0]          # lane-padded channel count

    x_nhwc = jnp.transpose(x_nchw, (0, 2, 3, 1))
    left = x_nhwc[..., :Cr]
    xr = jnp.pad(x_nhwc[..., Cr:], ((0, 0), (0, 0), (0, 0), (0, Cp - Cr)))

    TH = _pick_tile_h(H)
    nH = H // TH
    starts = np.arange(nH) * TH
    top_idx = np.clip(starts - 1, 0, H - 1)      # row above each tile (clamped)
    bot_idx = np.clip(starts + TH, 0, H - 1)     # row below each tile (clamped)
    halo = jnp.stack([xr[:, top_idx], xr[:, bot_idx]], axis=2)
    halo = halo.reshape(N, 2 * nH, W, Cp)        # [..., 2h]=top, [..., 2h+1]=bot

    yr = run_right_branch(xr, halo,
                          params['w1'], params['c1'], params['wdw'],
                          params['w3'], params['c3'],
                          tile_h=TH)[..., :Cr]

    # concat(left, right) + ChannelShuffle(groups=2) as a single interleave.
    out_nhwc = jnp.stack([left, yr], axis=-1).reshape(N, H, W, C)
    # TODO(synk): in a full NHWC network the NCHW<->NHWC transposes and this
    # interleave would be fused into neighbouring units / the kernel out_spec.
    return jnp.transpose(out_nhwc, (0, 3, 1, 2))


def make_params(key, in_channels, mxu_dtype=jnp.float32, eps=1e-5):
    """Synthetic BasicUnit(in_channels) parameters.

    Returns (kernel_params, raw_params): kernel_params have BN scales folded
    into the conv weights and channels zero-padded to a multiple of 128;
    raw_params are the unfolded torch-layout tensors used by the reference.
    """
    Cr = in_channels // 2
    Cp = max(128, ((Cr + 127) // 128) * 128)
    ks = jax.random.split(key, 9)

    def bn_params(k):
        k1, k2, k3, k4 = jax.random.split(k, 4)
        gamma = jax.random.uniform(k1, (Cr,), jnp.float32, 0.5, 1.5)
        beta = 0.1 * jax.random.normal(k2, (Cr,), jnp.float32)
        mean = 0.1 * jax.random.normal(k3, (Cr,), jnp.float32)
        var = jax.random.uniform(k4, (Cr,), jnp.float32, 0.5, 1.5)
        return gamma, beta, mean, var

    w1 = 0.2 * jax.random.normal(ks[0], (Cr, Cr), jnp.float32)     # [cout, cin]
    b1 = 0.1 * jax.random.normal(ks[1], (Cr,), jnp.float32)
    bn1 = bn_params(ks[2])
    wdw = 0.2 * jax.random.normal(ks[3], (Cr, 3, 3), jnp.float32)  # [c, kh, kw]
    b2 = 0.1 * jax.random.normal(ks[4], (Cr,), jnp.float32)
    bn2 = bn_params(ks[5])
    w3 = 0.2 * jax.random.normal(ks[6], (Cr, Cr), jnp.float32)     # [cout, cin]
    b3 = 0.1 * jax.random.normal(ks[7], (Cr,), jnp.float32)
    bn3 = bn_params(ks[8])

    raw = {'w1': w1, 'b1': b1, 'bn1': bn1,
           'wdw': wdw, 'b2': b2, 'bn2': bn2,
           'w3': w3, 'b3': b3, 'bn3': bn3}

    def fold(bn, bias):
        gamma, beta, mean, var = bn
        scale = gamma / jnp.sqrt(var + eps)
        return scale, beta + scale * (bias - mean)

    a1, c1 = fold(bn1, b1)
    a2, c2 = fold(bn2, b2)
    a3, c3 = fold(bn3, b3)

    w1s = w1.T * a1[None, :]                                   # (cin, cout)
    w3s = w3.T * a3[None, :]
    wdws = (wdw * a2[:, None, None]).transpose(1, 2, 0).reshape(9, Cr)
    c3e = c3 + c2 @ w3s                                        # BN2 shift -> conv3

    pc = Cp - Cr
    kparams = {
        'w1': jnp.pad(w1s, ((0, pc), (0, pc))).astype(mxu_dtype),
        'c1': jnp.pad(c1, (0, pc))[None, :],
        'wdw': jnp.pad(wdws, ((0, 0), (0, pc))),
        'w3': jnp.pad(w3s, ((0, pc), (0, pc))).astype(mxu_dtype),
        'c3': jnp.pad(c3e, (0, pc))[None, :],
    }
    return kparams, raw


def reference_forward(x_nchw, raw, eps=1e-5):
    """Pure-JAX reference mirroring the PyTorch module (eval-mode BN, unfolded)."""
    N, C, H, W = x_nchw.shape
    Cr = C // 2
    left = x_nchw[:, :Cr]
    xr = jnp.transpose(x_nchw[:, Cr:], (0, 2, 3, 1))

    def bn(y, stats):
        gamma, beta, mean, var = stats
        return (y - mean) / jnp.sqrt(var + eps) * gamma + beta

    h = jnp.einsum('nhwc,oc->nhwo', xr, raw['w1']) + raw['b1']
    h = jnp.maximum(bn(h, raw['bn1']), 0.0)

    hp = jnp.pad(h, ((0, 0), (1, 1), (1, 1), (0, 0)))
    acc = jnp.zeros_like(h)
    for dy in range(3):
        for dx in range(3):
            acc = acc + hp[:, dy:dy + H, dx:dx + W, :] * raw['wdw'][:, dy, dx]
    h = bn(acc + raw['b2'], raw['bn2'])

    h = jnp.einsum('nhwc,oc->nhwo', h, raw['w3']) + raw['b3']
    h = jnp.maximum(bn(h, raw['bn3']), 0.0)

    yr = jnp.transpose(h, (0, 3, 1, 2))
    cat = jnp.concatenate([left, yr], axis=1)
    return cat.reshape(N, 2, Cr, H, W).transpose(0, 2, 1, 3, 4).reshape(N, C, H, W)


if __name__ == "__main__":
    key = jax.random.PRNGKey(0)
    k_x, k_p = jax.random.split(key)

    N, C, H, W = 2, 8, 16, 16          # in_channels=8 -> right_channels=4
    x = jax.random.normal(k_x, (N, C, H, W), jnp.float32)

    kparams, raw = make_params(k_p, C)
    ref = reference_forward(x, raw)

    # f32-MXU path (reference-accurate everywhere, incl. v5e elementwise rules).
    out = jax.block_until_ready(basic_unit_forward(x, kparams))
    assert out.shape == (N, C, H, W)
    assert jnp.allclose(out, ref, rtol=1e-4, atol=1e-5), "f32 mismatch vs reference"

    # bf16 MXU-operand path (v6e/v7x): same kernel, matmul weights cast to bf16;
    # element-wise BN/ReLU math stays f32.
    kparams_bf16, _ = make_params(k_p, C, mxu_dtype=jnp.bfloat16)
    out_bf16 = jax.block_until_ready(basic_unit_forward(x, kparams_bf16))
    rel_err = jnp.linalg.norm(out_bf16 - ref) / jnp.linalg.norm(ref)
    assert float(rel_err) < 5e-2, "bf16 path diverged from reference"

    print("KERNEL_OK")
</pallas_src>

<mosaic_0001>
module attributes {stable_mosaic.version = 11 : i64} {
  func.func @right_branch_kernel(%arg0: i32, %arg1: i32, %arg2: memref<1x8x16x128xf32, #tpu.memory_space<vmem>>, %arg3: memref<1x2x16x128xf32, #tpu.memory_space<vmem>>, %arg4: memref<128x128xf32, #tpu.memory_space<vmem>>, %arg5: memref<1x128xf32, #tpu.memory_space<vmem>>, %arg6: memref<9x128xf32, #tpu.memory_space<vmem>>, %arg7: memref<128x128xf32, #tpu.memory_space<vmem>>, %arg8: memref<1x128xf32, #tpu.memory_space<vmem>>, %arg9: memref<1x8x16x128xf32, #tpu.memory_space<vmem>>, %arg10: memref<10x18x128xf32, #tpu.memory_space<vmem>>, %arg11: memref<8x16x128xf32, #tpu.memory_space<vmem>>) attributes {dimension_semantics = [#tpu.dimension_semantics<parallel>, #tpu.dimension_semantics<parallel>], iteration_bounds = array<i64: 2, 2>, scalar_prefetch = 0 : i64, scratch_operands = 2 : i64, tpu.core_type = #tpu.core_type<tc>, window_params = [{transform_indices = @transform_0, window_bounds = array<i64: 1, 8, 16, 128>}, {transform_indices = @transform_1, window_bounds = array<i64: 1, 2, 16, 128>}, {pipeline_mode = #tpu.pipeline_mode<synchronous>, transform_indices = @transform_2, window_bounds = array<i64: 128, 128>}, {pipeline_mode = #tpu.pipeline_mode<synchronous>, transform_indices = @transform_3, window_bounds = array<i64: 1, 128>}, {pipeline_mode = #tpu.pipeline_mode<synchronous>, transform_indices = @transform_4, window_bounds = array<i64: 9, 128>}, {pipeline_mode = #tpu.pipeline_mode<synchronous>, transform_indices = @transform_5, window_bounds = array<i64: 128, 128>}, {pipeline_mode = #tpu.pipeline_mode<synchronous>, transform_indices = @transform_6, window_bounds = array<i64: 1, 128>}, {transform_indices = @transform_7, window_bounds = array<i64: 1, 8, 16, 128>}]} {
    %c0 = arith.constant 0 : index
    %c0_0 = arith.constant 0 : index
    %c0_1 = arith.constant 0 : index
    %c0_2 = arith.constant 0 : index
    %0 = vector.load %arg2[%c0, %c0_0, %c0_1, %c0_2] : memref<1x8x16x128xf32, #tpu.memory_space<vmem>>, vector<1x8x16x128xf32>
    %1 = vector.shape_cast %0 : vector<1x8x16x128xf32> to vector<8x16x128xf32>
    %2 = vector.shape_cast %1 : vector<8x16x128xf32> to vector<128x128xf32>
    %c0_3 = arith.constant 0 : index
    %c0_4 = arith.constant 0 : index
    %3 = vector.load %arg4[%c0_3, %c0_4] : memref<128x128xf32, #tpu.memory_space<vmem>>, vector<128x128xf32>
    %cst = arith.constant dense<0.000000e+00> : vector<128x128xf32>
    %4 = tpu.matmul %2, %3, %cst {dimension_numbers = #tpu.dot_dimension_numbers<[1], [0], [0], [1], [0, 0, 1, 1], [], []>} : vector<128x128xf32>, vector<128x128xf32>, vector<128x128xf32> -> vector<128x128xf32>
    %c0_5 = arith.constant 0 : index
    %c0_6 = arith.constant 0 : index
    %5 = vector.load %arg5[%c0_5, %c0_6] : memref<1x128xf32, #tpu.memory_space<vmem>>, vector<1x128xf32>
    %6 = vector.broadcast %5 : vector<1x128xf32> to vector<128x128xf32>
    %7 = arith.addf %4, %6 : vector<128x128xf32>
    %cst_7 = arith.constant 0.000000e+00 : f32
    %8 = vector.broadcast %cst_7 : f32 to vector<128x128xf32>
    %9 = arith.maximumf %7, %8 : vector<128x128xf32>
    %c0_8 = arith.constant 0 : index
    %c0_9 = arith.constant 0 : index
    %c0_10 = arith.constant 0 : index
    %c0_11 = arith.constant 0 : index
    %10 = vector.load %arg3[%c0_8, %c0_9, %c0_10, %c0_11] : memref<1x2x16x128xf32, #tpu.memory_space<vmem>>, vector<1x2x16x128xf32>
    %11 = vector.shape_cast %10 : vector<1x2x16x128xf32> to vector<2x16x128xf32>
    %12 = vector.shape_cast %11 : vector<2x16x128xf32> to vector<32x128xf32>
    %c0_12 = arith.constant 0 : index
    %c0_13 = arith.constant 0 : index
    %13 = vector.load %arg4[%c0_12, %c0_13] : memref<128x128xf32, #tpu.memory_space<vmem>>, vector<128x128xf32>
    %cst_14 = arith.constant dense<0.000000e+00> : vector<32x128xf32>
    %14 = tpu.matmul %12, %13, %cst_14 {dimension_numbers = #tpu.dot_dimension_numbers<[1], [0], [0], [1], [0, 0, 1, 1], [], []>} : vector<32x128xf32>, vector<128x128xf32>, vector<32x128xf32> -> vector<32x128xf32>
    %c0_15 = arith.constant 0 : index
    %c0_16 = arith.constant 0 : index
    %15 = vector.load %arg5[%c0_15, %c0_16] : memref<1x128xf32, #tpu.memory_space<vmem>>, vector<1x128xf32>
    %16 = vector.broadcast %15 : vector<1x128xf32> to vector<32x128xf32>
    %17 = arith.addf %14, %16 : vector<32x128xf32>
    %cst_17 = arith.constant 0.000000e+00 : f32
    %18 = vector.broadcast %cst_17 : f32 to vector<32x128xf32>
    %19 = arith.maximumf %17, %18 : vector<32x128xf32>
    %20 = vector.shape_cast %19 : vector<32x128xf32> to vector<2x16x128xf32>
    %c0_i32 = arith.constant 0 : i32
    %21 = arith.cmpi sgt, %arg1, %c0_i32 : i32
    %22 = vector.extract_strided_slice %20 {offsets = [0, 0, 0], sizes = [1, 16, 128], strides = [1, 1, 1]} : vector<2x16x128xf32> to vector<1x16x128xf32>
    %23 = vector.shape_cast %22 : vector<1x16x128xf32> to vector<16x128xf32>
    %cst_18 = arith.constant 0.000000e+00 : f32
    %24 = vector.broadcast %cst_18 : f32 to vector<16x128xf32>
    %25 = arith.select %21, %23, %24 : vector<16x128xf32>
    %c1_i32 = arith.constant 1 : i32
    %26 = arith.cmpi slt, %arg1, %c1_i32 : i32
    %27 = vector.extract_strided_slice %20 {offsets = [1, 0, 0], sizes = [1, 16, 128], strides = [1, 1, 1]} : vector<2x16x128xf32> to vector<1x16x128xf32>
    %28 = vector.shape_cast %27 : vector<1x16x128xf32> to vector<16x128xf32>
    %cst_19 = arith.constant 0.000000e+00 : f32
    %29 = vector.broadcast %cst_19 : f32 to vector<16x128xf32>
    %30 = arith.select %26, %28, %29 : vector<16x128xf32>
    %cst_20 = arith.constant 0.000000e+00 : f32
    %31 = vector.broadcast %cst_20 : f32 to vector<10x1x128xf32>
    %c0_21 = arith.constant 0 : index
    %c0_22 = arith.constant 0 : index
    %c0_23 = arith.constant 0 : index
    %32 = vector.load %arg10[%c0_21, %c0_22, %c0_23] : memref<10x18x128xf32, #tpu.memory_space<vmem>>, vector<10x1x128xf32>
    tpu.vector_store %arg10[%c0_21, %c0_22, %c0_23], %31 {strides = array<i32>} : memref<10x18x128xf32, #tpu.memory_space<vmem>>, vector<10x1x128xf32>,
    %c0_24 = arith.constant 0 : index
    %c17 = arith.constant 17 : index
    %c0_25 = arith.constant 0 : index
    %33 = vector.load %arg10[%c0_24, %c17, %c0_25] : memref<10x18x128xf32, #tpu.memory_space<vmem>>, vector<10x1x128xf32>
    tpu.vector_store %arg10[%c0_24, %c17, %c0_25], %31 {strides = array<i32>} : memref<10x18x128xf32, #tpu.memory_space<vmem>>, vector<10x1x128xf32>,
    %34 = vector.shape_cast %25 : vector<16x128xf32> to vector<1x16x128xf32>
    %c0_26 = arith.constant 0 : index
    %c1 = arith.constant 1 : index
    %c0_27 = arith.constant 0 : index
    %35 = vector.load %arg10[%c0_26, %c1, %c0_27] : memref<10x18x128xf32, #tpu.memory_space<vmem>>, vector<1x16x128xf32>
    tpu.vector_store %arg10[%c0_26, %c1, %c0_27], %34 {strides = array<i32>} : memref<10x18x128xf32, #tpu.memory_space<vmem>>, vector<1x16x128xf32>,
    %36 = vector.shape_cast %30 : vector<16x128xf32> to vector<1x16x128xf32>
    %c9 = arith.constant 9 : index
    %c1_28 = arith.constant 1 : index
    %c0_29 = arith.constant 0 : index
    %37 = vector.load %arg10[%c9, %c1_28, %c0_29] : memref<10x18x128xf32, #tpu.memory_space<vmem>>, vector<1x16x128xf32>
    tpu.vector_store %arg10[%c9, %c1_28, %c0_29], %36 {strides = array<i32>} : memref<10x18x128xf32, #tpu.memory_space<vmem>>, vector<1x16x128xf32>,
    %38 = vector.shape_cast %9 : vector<128x128xf32> to vector<8x16x128xf32>
    %c1_30 = arith.constant 1 : index
    %c1_31 = arith.constant 1 : index
    %c0_32 = arith.constant 0 : index
    %39 = vector.load %arg10[%c1_30, %c1_31, %c0_32] : memref<10x18x128xf32, #tpu.memory_space<vmem>>, vector<8x16x128xf32>
    tpu.vector_store %arg10[%c1_30, %c1_31, %c0_32], %38 {strides = array<i32>} : memref<10x18x128xf32, #tpu.memory_space<vmem>>, vector<8x16x128xf32>,
    %c0_33 = arith.constant 0 : index
    %c0_34 = arith.constant 0 : index
    %c0_35 = arith.constant 0 : index
    %40 = vector.load %arg10[%c0_33, %c0_34, %c0_35] : memref<10x18x128xf32, #tpu.memory_space<vmem>>, vector<8x16x128xf32>
    %c0_36 = arith.constant 0 : index
    %c0_37 = arith.constant 0 : index
    %41 = vector.load %arg6[%c0_36, %c0_37] : memref<9x128xf32, #tpu.memory_space<vmem>>, vector<1x128xf32>
    %42 = vector.shape_cast %41 : vector<1x128xf32> to vector<1x1x128xf32>
    %43 = vector.broadcast %42 : vector<1x1x128xf32> to vector<8x16x128xf32>
    %44 = arith.mulf %40, %43 : vector<8x16x128xf32>
    %c0_38 = arith.constant 0 : index
    %c1_39 = arith.constant 1 : index
    %c0_40 = arith.constant 0 : index
    %45 = vector.load %arg10[%c0_38, %c1_39, %c0_40] : memref<10x18x128xf32, #tpu.memory_space<vmem>>, vector<8x16x128xf32>
    %c1_41 = arith.constant 1 : index
    %c0_42 = arith.constant 0 : index
    %46 = vector.load %arg6[%c1_41, %c0_42] : memref<9x128xf32, #tpu.memory_space<vmem>>, vector<1x128xf32>
    %47 = vector.shape_cast %46 : vector<1x128xf32> to vector<1x1x128xf32>
    %48 = vector.broadcast %47 : vector<1x1x128xf32> to vector<8x16x128xf32>
    %49 = arith.mulf %45, %48 : vector<8x16x128xf32>
    %50 = arith.addf %44, %49 : vector<8x16x128xf32>
    %c0_43 = arith.constant 0 : index
    %c2 = arith.constant 2 : index
    %c0_44 = arith.constant 0 : index
    %51 = vector.load %arg10[%c0_43, %c2, %c0_44] : memref<10x18x128xf32, #tpu.memory_space<vmem>>, vector<8x16x128xf32>
    %c2_45 = arith.constant 2 : index
    %c0_46 = arith.constant 0 : index
    %52 = vector.load %arg6[%c2_45, %c0_46] : memref<9x128xf32, #tpu.memory_space<vmem>>, vector<1x128xf32>
    %53 = vector.shape_cast %52 : vector<1x128xf32> to vector<1x1x128xf32>
    %54 = vector.broadcast %53 : vector<1x1x128xf32> to vector<8x16x128xf32>
    %55 = arith.mulf %51, %54 : vector<8x16x128xf32>
    %56 = arith.addf %50, %55 : vector<8x16x128xf32>
    %c0_47 = arith.constant 0 : index
    %c0_48 = arith.constant 0 : index
    %c0_49 = arith.constant 0 : index
    %57 = vector.load %arg11[%c0_47, %c0_48, %c0_49] : memref<8x16x128xf32, #tpu.memory_space<vmem>>, vector<8x16x128xf32>
    tpu.vector_store %arg11[%c0_47, %c0_48, %c0_49], %56 {strides = array<i32>} : memref<8x16x128xf32, #tpu.memory_space<vmem>>, vector<8x16x128xf32>,
    %c1_50 = arith.constant 1 : index
    %c0_51 = arith.constant 0 : index
    %c0_52 = arith.constant 0 : index
    %58 = vector.load %arg10[%c1_50, %c0_51, %c0_52] : memref<10x18x128xf32, #tpu.memory_space<vmem>>, vector<8x16x128xf32>
    %c3 = arith.constant 3 : index
    %c0_53 = arith.constant 0 : index
    %59 = vector.load %arg6[%c3, %c0_53] : memref<9x128xf32, #tpu.memory_space<vmem>>, vector<1x128xf32>
    %60 = vector.shape_cast %59 : vector<1x128xf32> to vector<1x1x128xf32>
    %61 = vector.broadcast %60 : vector<1x1x128xf32> to vector<8x16x128xf32>
    %62 = arith.mulf %58, %61 : vector<8x16x128xf32>
    %c1_54 = arith.constant 1 : index
    %c1_55 = arith.constant 1 : index
    %c0_56 = arith.constant 0 : index
    %63 = vector.load %arg10[%c1_54, %c1_55, %c0_56] : memref<10x18x128xf32, #tpu.memory_space<vmem>>, vector<8x16x128xf32>
    %c4 = arith.constant 4 : index
    %c0_57 = arith.constant 0 : index
    %64 = vector.load %arg6[%c4, %c0_57] : memref<9x128xf32, #tpu.memory_space<vmem>>, vector<1x128xf32>
    %65 = vector.shape_cast %64 : vector<1x128xf32> to vector<1x1x128xf32>
    %66 = vector.broadcast %65 : vector<1x1x128xf32> to vector<8x16x128xf32>
    %67 = arith.mulf %63, %66 : vector<8x16x128xf32>
    %68 = arith.addf %62, %67 : vector<8x16x128xf32>
    %c1_58 = arith.constant 1 : index
    %c2_59 = arith.constant 2 : index
    %c0_60 = arith.constant 0 : index
    %69 = vector.load %arg10[%c1_58, %c2_59, %c0_60] : memref<10x18x128xf32, #tpu.memory_space<vmem>>, vector<8x16x128xf32>
    %c5 = arith.constant 5 : index
    %c0_61 = arith.constant 0 : index
    %70 = vector.load %arg6[%c5, %c0_61] : memref<9x128xf32, #tpu.memory_space<vmem>>, vector<1x128xf32>
    %71 = vector.shape_cast %70 : vector<1x128xf32> to vector<1x1x128xf32>
    %72 = vector.broadcast %71 : vector<1x1x128xf32> to vector<8x16x128xf32>
    %73 = arith.mulf %69, %72 : vector<8x16x128xf32>
    %74 = arith.addf %68, %73 : vector<8x16x128xf32>
    %c0_62 = arith.constant 0 : index
    %c0_63 = arith.constant 0 : index
    %c0_64 = arith.constant 0 : index
    %75 = vector.load %arg11[%c0_62, %c0_63, %c0_64] : memref<8x16x128xf32, #tpu.memory_space<vmem>>, vector<8x16x128xf32>
    %76 = arith.addf %75, %74 : vector<8x16x128xf32>
    %c0_65 = arith.constant 0 : index
    %c0_66 = arith.constant 0 : index
    %c0_67 = arith.constant 0 : index
    %77 = vector.load %arg11[%c0_65, %c0_66, %c0_67] : memref<8x16x128xf32, #tpu.memory_space<vmem>>, vector<8x16x128xf32>
    tpu.vector_store %arg11[%c0_65, %c0_66, %c0_67], %76 {strides = array<i32>} : memref<8x16x128xf32, #tpu.memory_space<vmem>>, vector<8x16x128xf32>,
    %c2_68 = arith.constant 2 : index
    %c0_69 = arith.constant 0 : index
    %c0_70 = arith.constant 0 : index
    %78 = vector.load %arg10[%c2_68, %c0_69, %c0_70] : memref<10x18x128xf32, #tpu.memory_space<vmem>>, vector<8x16x128xf32>
    %c6 = arith.constant 6 : index
    %c0_71 = arith.constant 0 : index
    %79 = vector.load %arg6[%c6, %c0_71] : memref<9x128xf32, #tpu.memory_space<vmem>>, vector<1x128xf32>
    %80 = vector.shape_cast %79 : vector<1x128xf32> to vector<1x1x128xf32>
    %81 = vector.broadcast %80 : vector<1x1x128xf32> to vector<8x16x128xf32>
    %82 = arith.mulf %78, %81 : vector<8x16x128xf32>
    %c2_72 = arith.constant 2 : index
    %c1_73 = arith.constant 1 : index
    %c0_74 = arith.constant 0 : index
    %83 = vector.load %arg10[%c2_72, %c1_73, %c0_74] : memref<10x18x128xf32, #tpu.memory_space<vmem>>, vector<8x16x128xf32>
    %c7 = arith.constant 7 : index
    %c0_75 = arith.constant 0 : index
    %84 = vector.load %arg6[%c7, %c0_75] : memref<9x128xf32, #tpu.memory_space<vmem>>, vector<1x128xf32>
    %85 = vector.shape_cast %84 : vector<1x128xf32> to vector<1x1x128xf32>
    %86 = vector.broadcast %85 : vector<1x1x128xf32> to vector<8x16x128xf32>
    %87 = arith.mulf %83, %86 : vector<8x16x128xf32>
    %88 = arith.addf %82, %87 : vector<8x16x128xf32>
    %c2_76 = arith.constant 2 : index
    %c2_77 = arith.constant 2 : index
    %c0_78 = arith.constant 0 : index
    %89 = vector.load %arg10[%c2_76, %c2_77, %c0_78] : memref<10x18x128xf32, #tpu.memory_space<vmem>>, vector<8x16x128xf32>
    %c8 = arith.constant 8 : index
    %c0_79 = arith.constant 0 : index
    %90 = vector.load %arg6[%c8, %c0_79] : memref<9x128xf32, #tpu.memory_space<vmem>>, vector<1x128xf32>
    %91 = vector.shape_cast %90 : vector<1x128xf32> to vector<1x1x128xf32>
    %92 = vector.broadcast %91 : vector<1x1x128xf32> to vector<8x16x128xf32>
    %93 = arith.mulf %89, %92 : vector<8x16x128xf32>
    %94 = arith.addf %88, %93 : vector<8x16x128xf32>
    %c0_80 = arith.constant 0 : index
    %c0_81 = arith.constant 0 : index
    %c0_82 = arith.constant 0 : index
    %95 = vector.load %arg11[%c0_80, %c0_81, %c0_82] : memref<8x16x128xf32, #tpu.memory_space<vmem>>, vector<8x16x128xf32>
    %96 = arith.addf %95, %94 : vector<8x16x128xf32>
    %c0_83 = arith.constant 0 : index
    %c0_84 = arith.constant 0 : index
    %c0_85 = arith.constant 0 : index
    %97 = vector.load %arg11[%c0_83, %c0_84, %c0_85] : memref<8x16x128xf32, #tpu.memory_space<vmem>>, vector<8x16x128xf32>
    tpu.vector_store %arg11[%c0_83, %c0_84, %c0_85], %96 {strides = array<i32>} : memref<8x16x128xf32, #tpu.memory_space<vmem>>, vector<8x16x128xf32>,
    %c0_86 = arith.constant 0 : index
    %c0_87 = arith.constant 0 : index
    %c0_88 = arith.constant 0 : index
    %98 = vector.load %arg11[%c0_86, %c0_87, %c0_88] : memref<8x16x128xf32, #tpu.memory_space<vmem>>, vector<8x16x128xf32>
    %99 = vector.shape_cast %98 : vector<8x16x128xf32> to vector<128x128xf32>
    %c0_89 = arith.constant 0 : index
    %c0_90 = arith.constant 0 : index
    %100 = vector.load %arg7[%c0_89, %c0_90] : memref<128x128xf32, #tpu.memory_space<vmem>>, vector<128x128xf32>
    %cst_91 = arith.constant dense<0.000000e+00> : vector<128x128xf32>
    %101 = tpu.matmul %99, %100, %cst_91 {dimension_numbers = #tpu.dot_dimension_numbers<[1], [0], [0], [1], [0, 0, 1, 1], [], []>} : vector<128x128xf32>, vector<128x128xf32>, vector<128x128xf32> -> vector<128x128xf32>
    %c0_92 = arith.constant 0 : index
    %c0_93 = arith.constant 0 : index
    %102 = vector.load %arg8[%c0_92, %c0_93] : memref<1x128xf32, #tpu.memory_space<vmem>>, vector<1x128xf32>
    %103 = vector.broadcast %102 : vector<1x128xf32> to vector<128x128xf32>
    %104 = arith.addf %101, %103 : vector<128x128xf32>
    %cst_94 = arith.constant 0.000000e+00 : f32
    %105 = vector.broadcast %cst_94 : f32 to vector<128x128xf32>
    %106 = arith.maximumf %104, %105 : vector<128x128xf32>
    %107 = vector.shape_cast %106 : vector<128x128xf32> to vector<1x8x16x128xf32>
    %c0_95 = arith.constant 0 : index
    %c0_96 = arith.constant 0 : index
    %c0_97 = arith.constant 0 : index
    %c0_98 = arith.constant 0 : index
    %108 = vector.load %arg9[%c0_95, %c0_96, %c0_97, %c0_98] : memref<1x8x16x128xf32, #tpu.memory_space<vmem>>, vector<1x8x16x128xf32>
    tpu.vector_store %arg9[%c0_95, %c0_96, %c0_97, %c0_98], %107 {strides = array<i32>} : memref<1x8x16x128xf32, #tpu.memory_space<vmem>>, vector<1x8x16x128xf32>,
    return
  }
  func.func @transform_0(%arg0: i32, %arg1: i32) -> (i32, i32, i32, i32) {
    %c0_i32 = arith.constant 0 : i32
    %c0_i32_0 = arith.constant 0 : i32
    %c0_i32_1 = arith.constant 0 : i32
    return %arg0, %arg1, %c0_i32, %c0_i32_0 : i32, i32, i32, i32
  }
  func.func @transform_1(%arg0: i32, %arg1: i32) -> (i32, i32, i32, i32) {
    %c0_i32 = arith.constant 0 : i32
    %c0_i32_0 = arith.constant 0 : i32
    %c0_i32_1 = arith.constant 0 : i32
    return %arg0, %arg1, %c0_i32, %c0_i32_0 : i32, i32, i32, i32
  }
  func.func @transform_2(%arg0: i32, %arg1: i32) -> (i32, i32) {
    %c0_i32 = arith.constant 0 : i32
    %c0_i32_0 = arith.constant 0 : i32
    %c0_i32_1 = arith.constant 0 : i32
    return %c0_i32, %c0_i32_0 : i32, i32
  }
  func.func @transform_3(%arg0: i32, %arg1: i32) -> (i32, i32) {
    %c0_i32 = arith.constant 0 : i32
    %c0_i32_0 = arith.constant 0 : i32
    %c0_i32_1 = arith.constant 0 : i32
    return %c0_i32, %c0_i32_0 : i32, i32
  }
  func.func @transform_4(%arg0: i32, %arg1: i32) -> (i32, i32) {
    %c0_i32 = arith.constant 0 : i32
    %c0_i32_0 = arith.constant 0 : i32
    %c0_i32_1 = arith.constant 0 : i32
    return %c0_i32, %c0_i32_0 : i32, i32
  }
  func.func @transform_5(%arg0: i32, %arg1: i32) -> (i32, i32) {
    %c0_i32 = arith.constant 0 : i32
    %c0_i32_0 = arith.constant 0 : i32
    %c0_i32_1 = arith.constant 0 : i32
    return %c0_i32, %c0_i32_0 : i32, i32
  }
  func.func @transform_6(%arg0: i32, %arg1: i32) -> (i32, i32) {
    %c0_i32 = arith.constant 0 : i32
    %c0_i32_0 = arith.constant 0 : i32
    %c0_i32_1 = arith.constant 0 : i32
    return %c0_i32, %c0_i32_0 : i32, i32
  }
  func.func @transform_7(%arg0: i32, %arg1: i32) -> (i32, i32, i32, i32) {
    %c0_i32 = arith.constant 0 : i32
    %c0_i32_0 = arith.constant 0 : i32
    %c0_i32_1 = arith.constant 0 : i32
    return %arg0, %arg1, %c0_i32, %c0_i32_0 : i32, i32, i32, i32
  }
}

</mosaic_0001>

<bundles_post_ra>
// kernel: basic_unit_forward.1
= control target key start
LH: loop header
LB: loop body
LE: loop exit
PB: predicated region body
PF: predicated region fallthrough
CT: control target
= control target key end

     0   :  { %s2069_s24 = smov 0   ;;  %s2071_s25 = smov 0   ;;  %s2758_s0 = inlined_call_operand.vmem [shape: f32[2,16,16,128], index: 0, kind: input, shape index: {}]   ;;  %s2759_s1 = inlined_call_operand.vmem [shape: f32[2,4,16,128], index: 1, kind: input, shape index: {}]   ;;  %s2760_s2 = inlined_call_operand.vmem [shape: f32[128,128], index: 2, kind: input, shape index: {}]   ;;  %s2761_s3 = inlined_call_operand.vmem [shape: f32[1,128], index: 3, kind: input, shape index: {}]   ;;  %s2762_s4 = inlined_call_operand.vmem [shape: f32[9,128], index: 4, kind: input, shape index: {}]   ;;  %s2763_s5 = inlined_call_operand.vmem [shape: f32[128,128], index: 5, kind: input, shape index: {}]   ;;  %s2764_s6 = inlined_call_operand.vmem [shape: f32[1,128], index: 6, kind: input, shape index: {}]   ;;  %s2765_s7 = inlined_call_operand.vmem [shape: f32[2,16,16,128], index: 7, kind: output, shape index: {}]  }
   0x1   :  { %s2073_s26 = smov 0   ;;  %s2075_s27 = smov 0  }
   0x2   :  { %s2077_s28 = smov 0  }
   0x3 LB: > { %s26_s29 = sadd.s32 1, %s2018_s26  ;;  %s29_s30 = sadd.s32 1, %s2022_s27  ;;  %s2026_s28 = sphi %s2077_s28, %s17_s28   ;;  %s2022_s27 = sphi %s2075_s27, %s2784_s27   ;;  %s2018_s26 = sphi %s2073_s26, %s2783_s26   ;;  %s2014_s25 = sphi %s2071_s25, %s2782_s25   ;;  %s2010_s24 = sphi %s2069_s24, %s2781_s24  }
   0x4   : > { %p27_p0 = scmp.ge.s32.totalorder %s26_s29, 2  ;;  %p1591_p1 = scmp.ge.s32.totalorder %s2026_s28, 1 }
   0x5   : > { %p277_p2 = scmp.lt.s32.totalorder %s2026_s28, 5 }
   0x6   : > { %s2786_s29 = smov (%p27_p0, %s26_s29), 0  ;;  %s2788_s30 = smov (!%p27_p0, %s29_s30), %s2022_s27 }
   0x7   : > { %p278_p3 = pnand %p1591_p1, %p277_p2  ;;  %p31_p4 = scmp.ge.s32.totalorder %s2788_s30, 2 }
   0x9   : > { %s2790_s30 = smov (%p31_p4, %s2788_s30), 0  ;;  %281 = sbr.rel (%p278_p3) target bundleno = 572 (0x23c), region = 48 }
  0x10   : > { %v378_v0 = vld [vmem:[%s2760_s2] sm:$0xff]  ;;  %v379_v1 = vld [vmem:[%s2760_s2 + $0x8] sm:$0xff]  ;;  %v380_v2 = vld [vmem:[%s2760_s2 + $0x10] sm:$0xff]  ;;  %s1592_s14 = sshll.u32 %s2010_s24, 3  ;;  %p330_p5 = scmp.lt.s32.totalorder %s2014_s25, 1  ;;  %v2028_v44 = vmov 0.0  }
  0x11   : > { %v1851_v3 = vpack.c.bf16 %v379_v1, %v378_v0  ;;  %v381_v4 = vld [vmem:[%s2760_s2 + $0x18] sm:$0xff]  ;;  %p332_p6 = scmp.lt.s32.totalorder %s1592_s14, 15  ;;  %v382_v6 = vld [vmem:[%s2760_s2 + $0x20] sm:$0xff]  ;;  %v383_v7 = vld [vmem:[%s2760_s2 + $0x28] sm:$0xff]  ;;  %s1596_s19 = sshll.u32 %s2010_s24, 1 }
  0x12   : > { %v1855_v5 = vpack.c.bf16 %v381_v4, %v380_v2  ;;  %s2792_s25 = smov (!%p330_p5, %s2014_s25), 1  ;;  %v1859_v8 = vpack.c.bf16 %v383_v7, %v382_v6  ;;  %v384_v9 = vld [vmem:[%s2760_s2 + $0x30] sm:$0xff]  ;;  %v385_v10 = vld [vmem:[%s2760_s2 + $0x38] sm:$0xff]  ;;  %v386_v13 = vld [vmem:[%s2760_s2 + $0x40] sm:$0xff]  ;;  %p343_p7 = scmp.lt.s32.totalorder %s1596_s19, 3 }
  0x13   : > { %1852 = vmatprep.subr.bf16.mxu1 %v1851_v3  ;;  %s2794_s14 = smov (!%p332_p6, %s1592_s14), 15  ;;  %s1594_s21 = sshll.u32 %s2792_s25, 5  ;;  %v1863_v11 = vpack.c.bf16 %v385_v10, %v384_v9  ;;  %v387_v14 = vld [vmem:[%s2760_s2 + $0x48] sm:$0xff]  ;;  %v388_v16 = vld [vmem:[%s2760_s2 + $0x50] sm:$0xff]  ;;  %v389_v17 = vld [vmem:[%s2760_s2 + $0x58] sm:$0xff] }
  0x14   : > { %1854 = vmatpush3.bf16.msra.mxu1 %v1851_v3  ;;  %s1593_s22 = sshll.u32 %s2794_s14, 1  ;;  %v1867_v15 = vpack.c.bf16 %v387_v14, %v386_v13  ;;  %v1871_v18 = vpack.c.bf16 %v389_v17, %v388_v16  ;;  %v390_v19 = vld [vmem:[%s2760_s2 + $0x60] sm:$0xff]  ;;  %v391_v20 = vld [vmem:[%s2760_s2 + $0x68] sm:$0xff]  ;;  %v392_v22 = vld [vmem:[%s2760_s2 + $0x70] sm:$0xff]  ;;  %s2796_s19 = smov (!%p343_p7, %s1596_s19), 3 }
  0x15   : > { %1856 = vmatprep.subr.bf16.mxu1 %v1855_v5  ;;  %s2129_s11 = sadd.s32 %s1594_s21, %s1593_s22  ;;  %v1875_v21 = vpack.c.bf16 %v391_v20, %v390_v19  ;;  %v393_v23 = vld [vmem:[%s2760_s2 + $0x78] sm:$0xff]  ;;  %s1597_s20 = sshll.u32 %s2796_s19, 1  ;;  %667 = vst [vmem:[#allocation2] sm:$0x1] %v2028_v44  ;;  %668 = vst [vmem:[#allocation2 + $0x18] sm:$0x1] %v2028_v44 }
  0x16   : > { %s1595_s12 = sshll.u32 %s2129_s11, 3  ;;  %v1879_v24 = vpack.c.bf16 %v393_v23, %v392_v22  ;;  %s1598_s21 = sshll.u32 %s2792_s25, 3  ;;  %669 = vst [vmem:[#allocation2 + $0x30] sm:$0x1] %v2028_v44  ;;  %670 = vst [vmem:[#allocation2 + $0x48] sm:$0x1] %v2028_v44 }
  0x17   : > { %s2137_s16 = scalar_lea.vmem %s2758_s0, %s1595_s12  ;;  %s347_s22 = sadd.s32 %s1598_s21, %s1597_s20  ;;  %671 = vst [vmem:[#allocation2 + $0x60] sm:$0x1] %v2028_v44  ;;  %672 = vst [vmem:[#allocation2 + $0x78] sm:$0x1] %v2028_v44  ;;  %v1267_v45 = vld [vmem:[%s2763_s5] sm:$0xff]  ;;  %v1268_v46 = vld [vmem:[%s2763_s5 + $0x8] sm:$0xff] }
  0x18   : > { %1858 = vmatpush3.bf16.msra.mxu1 %v1855_v5  ;;  %v362_v12 = vld [vmem:[%s2137_s16] sm:$0xff]  ;;  %v363_v25 = vld [vmem:[%s2137_s16 + $0x8] sm:$0xff]  ;;  %v364_v26 = vld [vmem:[%s2137_s16 + $0x10] sm:$0xff]  ;;  %s1599_s23 = sshll.u32 %s347_s22, 3  ;;  %673 = vst [vmem:[#allocation2 + $0x90] sm:$0x1] %v2028_v44  ;;  %v1915_v47 = vpack.c.bf16 %v1268_v46, %v1267_v45 }
  0x19   : > { %1860 = vmatprep.subr.bf16.mxu1 %v1859_v8  ;;  %1733 = vmatprep.mubr.f32.mxu1 %v362_v12  ;;  %v365_v27 = vld [vmem:[%s2137_s16 + $0x18] sm:$0xff]  ;;  %v366_v28 = vld [vmem:[%s2137_s16 + $0x20] sm:$0xff]  ;;  %v367_v29 = vld [vmem:[%s2137_s16 + $0x28] sm:$0xff]  ;;  %s349_s10 = scalar_lea.vmem %s2759_s1, %s1599_s23  ;;  %674 = vst [vmem:[#allocation2 + $0xa8] sm:$0x1] %v2028_v44  ;;  %p655_p8 = scmp.gt.s32.totalorder %s2010_s24, 0 }
  0x1a   : > { %v368_v30 = vld [vmem:[%s2137_s16 + $0x30] sm:$0xff]  ;;  %v369_v31 = vld [vmem:[%s2137_s16 + $0x38] sm:$0xff]  ;;  %v370_v32 = vld [vmem:[%s2137_s16 + $0x40] sm:$0xff]  ;;  %675 = vst [vmem:[#allocation2 + $0xc0] sm:$0x1] %v2028_v44  ;;  %1916 = vmatprep.subr.bf16.mxu0 %v1915_v47  ;;  %p661_p9 = scmp.lt.s32.totalorder %s2010_s24, 1  ;;  %s2725_s23 = scalar_lea.vmem %s2765_s7, %s1595_s12 }
  0x1b   : > { %v371_v33 = vld [vmem:[%s2137_s16 + $0x48] sm:$0xff]  ;;  %v372_v34 = vld [vmem:[%s2137_s16 + $0x50] sm:$0xff]  ;;  %v373_v35 = vld [vmem:[%s2137_s16 + $0x58] sm:$0xff]  ;;  %676 = vst [vmem:[#allocation2 + $0xd8] sm:$0x1] %v2028_v44  ;;  %1918 = vmatpush3.bf16.msra.mxu0 %v1915_v47 }
  0x1c   : > { %1862 = vmatpush3.bf16.msra.mxu1 %v1859_v8  ;;  %v374_v36 = vld [vmem:[%s2137_s16 + $0x60] sm:$0xff]  ;;  %v375_v37 = vld [vmem:[%s2137_s16 + $0x68] sm:$0xff]  ;;  %v376_v38 = vld [vmem:[%s2137_s16 + $0x70] sm:$0xff]  ;;  %677 = vst [vmem:[#allocation2 + $0x11] sm:$0x1] %v2028_v44 }
  0x1d   : > { %1864 = vmatprep.subr.bf16.mxu1 %v1863_v11  ;;  %v377_v39 = vld [vmem:[%s2137_s16 + $0x78] sm:$0xff]  ;;  %v562_v40 = vld [vmem:[%s349_s10] sm:$0xff]  ;;  %v563_v41 = vld [vmem:[%s349_s10 + $0x8] sm:$0xff]  ;;  %678 = vst [vmem:[#allocation2 + $0x29] sm:$0x1] %v2028_v44 }
  0x1e   : > { %v564_v42 = vld [vmem:[%s349_s10 + $0x10] sm:$0xff]  ;;  %v565_v43 = vld [vmem:[%s349_s10 + $0x18] sm:$0xff]  ;;  %679 = vst [vmem:[#allocation2 + $0x41] sm:$0x1] %v2028_v44  ;;  %680 = vst [vmem:[#allocation2 + $0x59] sm:$0x1] %v2028_v44 }
  0x1f   : > { %681 = vst [vmem:[#allocation2 + $0x71] sm:$0x1] %v2028_v44  ;;  %682 = vst [vmem:[#allocation2 + $0x89] sm:$0x1] %v2028_v44  ;;  %v1269_v48 = vld [vmem:[%s2763_s5 + $0x10] sm:$0xff]  ;;  %v1270_v49 = vld [vmem:[%s2763_s5 + $0x18] sm:$0xff] }
  0x20   : > { %1866 = vmatpush3.bf16.msra.mxu1 %v1863_v11  ;;  %683 = vst [vmem:[#allocation2 + $0xa1] sm:$0x1] %v2028_v44  ;;  %684 = vst [vmem:[#allocation2 + $0xb9] sm:$0x1] %v2028_v44  ;;  %v1919_v50 = vpack.c.bf16 %v1270_v49, %v1269_v48  ;;  %v1271_v51 = vld [vmem:[%s2763_s5 + $0x20] sm:$0xff]  ;;  %v1272_v52 = vld [vmem:[%s2763_s5 + $0x28] sm:$0xff] }
  0x21   : > { %1868 = vmatprep.subr.bf16.mxu1 %v1867_v15  ;;  %685 = vst [vmem:[#allocation2 + $0xd1] sm:$0x1] %v2028_v44  ;;  %686 = vst [vmem:[#allocation2 + $0xe9] sm:$0x1] %v2028_v44  ;;  %v1923_v53 = vpack.c.bf16 %v1272_v52, %v1271_v51  ;;  %v1273_v54 = vld [vmem:[%s2763_s5 + $0x30] sm:$0xff]  ;;  %v1274_v55 = vld [vmem:[%s2763_s5 + $0x38] sm:$0xff] }
  0x22   : > { %1920 = vmatprep.subr.bf16.mxu0 %v1919_v50  ;;  %v1927_v56 = vpack.c.bf16 %v1274_v55, %v1273_v54  ;;  %v1275_v57 = vld [vmem:[%s2763_s5 + $0x40] sm:$0xff]  ;;  %v1276_v58 = vld [vmem:[%s2763_s5 + $0x48] sm:$0xff]  ;;  %v1277_v60 = vld [vmem:[%s2763_s5 + $0x50] sm:$0xff]  ;;  %s2241_s14 = scalar_select %p655_p8, 1, 0 }
  0x23   : > { %1922 = vmatpush3.bf16.msra.mxu0 %v1919_v50  ;;  %v1931_v59 = vpack.c.bf16 %v1276_v58, %v1275_v57  ;;  %v1278_v61 = vld [vmem:[%s2763_s5 + $0x58] sm:$0xff]  ;;  %v1279_v62 = vld [vmem:[%s2763_s5 + $0x60] sm:$0xff]  ;;  %v1280_v0 = vld [vmem:[%s2763_s5 + $0x68] sm:$0xff]  ;;  %s2244_s17 = scalar_select %p661_p9, 1, 0 }
  0x24   : > { %1870 = vmatpush3.bf16.msra.mxu1 %v1867_v15  ;;  %1924 = vmatprep.subr.bf16.mxu0 %v1923_v53  ;;  %v1935_v63 = vpack.c.bf16 %v1278_v61, %v1277_v60  ;;  %v1939_v1 = vpack.c.bf16 %v1280_v0, %v1279_v62  ;;  %v1281_v2 = vld [vmem:[%s2763_s5 + $0x70] sm:$0xff]  ;;  %v2250_v17 = vld [vmem:[%s2762_s4 + $0x1] ss:$0 sm:$0xff]  ;;  %v2320_v54 = vld [vmem:[%s2762_s4 + $0x8] ss:$0 sm:$0xff] }
  0x25   : > { %1872 = vmatprep.subr.bf16.mxu1 %v1871_v18 }
  0x27   : > { %1926 = vmatpush3.bf16.msra.mxu0 %v1923_v53 }
  0x28   : > { %1874 = vmatpush3.bf16.msra.mxu1 %v1871_v18  ;;  %1928 = vmatprep.subr.bf16.mxu0 %v1927_v56 }
  0x29   : > { %1876 = vmatprep.subr.bf16.mxu1 %v1875_v21 }
  0x2b   : > { %1930 = vmatpush3.bf16.msra.mxu0 %v1927_v56 }
  0x2c   : > { %1878 = vmatpush3.bf16.msra.mxu1 %v1875_v21  ;;  %1932 = vmatprep.subr.bf16.mxu0 %v1931_v59 }
  0x2d   : > { %1880 = vmatprep.subr.bf16.mxu1 %v1879_v24 }
  0x2f   : > { %1934 = vmatpush3.bf16.msra.mxu0 %v1931_v59  ;;  %v2333_v59 = vld [vmem:[%s2762_s4 + $0x6] ss:$0 sm:$0xff] }
  0x30   : > { %1882 = vmatpush3.bf16.msra.mxu1 %v1879_v24  ;;  %1936 = vmatprep.subr.bf16.mxu0 %v1935_v63 }
  0x31   : > { %1884 = vmatprep.subr.bf16.mxu1 %v1851_v3 }
  0x33   : > { %1734 = vmatmul.mubr.f32.vlgmr.msra.gmra.mrb[0].mxu1 %v363_v25  ;;  %1938 = vmatpush3.bf16.msra.mxu0 %v1935_v63  ;;  %v663_v25 = vstv %s2244_s17 }
  0x34   : > { %1886 = vmatpush3.bf16.msra.mxu1 %v1851_v3  ;;  %1736 = vmatprep.mubr.f32.mxu1 %v364_v26  ;;  %v1282_v3 = vld [vmem:[%s2763_s5 + $0x78] sm:$0xff]  ;;  %vm2439_vm1 = vcmp.eq.s32.totalorder %v663_v25, 1 }
  0x35   : > { %1888 = vmatprep.subr.bf16.mxu1 %v1855_v5  ;;  %1940 = vmatprep.subr.bf16.mxu0 %v1939_v1  ;;  %v1943_v4 = vpack.c.bf16 %v1282_v3, %v1281_v2 }
  0x37   : > { %1737 = vmatmul.mubr.f32.gmra.mrb[2].mxu1 %v365_v27  ;;  %1942 = vmatpush3.bf16.msra.mxu0 %v1939_v1  ;;  %v2269_v27 = vld [vmem:[%s2762_s4 + $0x2] ss:$0 sm:$0xff] }
  0x38   : > { %1890 = vmatpush3.bf16.msra.mxu1 %v1855_v5  ;;  %1739 = vmatprep.mubr.f32.mxu1 %v366_v28  ;;  %v2235_v5 = vld [vmem:[%s2761_s3] ss:$0 sm:$0xff] }
  0x39   : > { %1892 = vmatprep.subr.bf16.mxu1 %v1859_v8  ;;  %1944 = vmatprep.subr.bf16.mxu0 %v1943_v4 }
  0x3b   : > { %1740 = vmatmul.mubr.f32.gmra.mrb[4].mxu1 %v367_v29  ;;  %1946 = vmatpush3.bf16.msra.mxu0 %v1943_v4  ;;  %v2275_v29 = vld [vmem:[%s2762_s4 + $0x5] ss:$0 sm:$0xff] }
  0x3c   : > { %1894 = vmatpush3.bf16.msra.mxu1 %v1859_v8  ;;  %1742 = vmatprep.mubr.f32.mxu1 %v368_v30 }
  0x3d   : > { %1896 = vmatprep.subr.bf16.mxu1 %v1863_v11 }
  0x3f   : > { %1743 = vmatmul.mubr.f32.gmra.mrb[6].mxu1 %v369_v31 }
  0x40   : > { %1898 = vmatpush3.bf16.msra.mxu1 %v1863_v11  ;;  %1745 = vmatprep.mubr.f32.mxu1 %v370_v32 }
  0x41   : > { %1900 = vmatprep.subr.bf16.mxu1 %v1867_v15 }
  0x43   : > { %1746 = vmatmul.mubr.f32.gmra.mrb[8].mxu1 %v371_v33  ;;  %v2286_v33 = vld [vmem:[%s2762_s4 + $0x3] ss:$0 sm:$0xff] }
  0x44   : > { %1902 = vmatpush3.bf16.msra.mxu1 %v1867_v15  ;;  %1748 = vmatprep.mubr.f32.mxu1 %v372_v34 }
  0x45   : > { %1904 = vmatprep.subr.bf16.mxu1 %v1871_v18 }
  0x47   : > { %1749 = vmatmul.mubr.f32.gmra.mrb[10].mxu1 %v373_v35 }
  0x48   : > { %1906 = vmatpush3.bf16.msra.mxu1 %v1871_v18  ;;  %1751 = vmatprep.mubr.f32.mxu1 %v374_v36  ;;  %v2255_v18 = vld [vmem:[%s2762_s4 + $0x4] ss:$0 sm:$0xff] }
  0x49   : > { %1908 = vmatprep.subr.bf16.mxu1 %v1875_v21 }
  0x4b   : > { %1752 = vmatmul.mubr.f32.gmra.mrb[12].mxu1 %v375_v37 }
  0x4c   : > { %1910 = vmatpush3.bf16.msra.mxu1 %v1875_v21  ;;  %1754 = vmatprep.mubr.f32.mxu1 %v376_v38  ;;  %v2260_v21 = vld [vmem:[%s2762_s4 + $0x7] ss:$0 sm:$0xff] }
  0x4d   : > { %1912 = vmatprep.subr.bf16.mxu1 %v1879_v24 }
  0x4f   : > { %1755 = vmatmul.mubr.f32.gmra.mrb[14].mxu1 %v377_v39  ;;  %v2300_v39 = vld [vmem:[%s2762_s4] ss:$0 sm:$0xff] }
  0x50   : > { %1914 = vmatpush3.bf16.msra.mxu1 %v1879_v24  ;;  %1789 = vmatprep.mubr.f32.mxu1 %v562_v40  ;;  %v657_v24 = vstv %s2241_s14 }
  0x51   : > { %vm2410_vm0 = vcmp.eq.s32.totalorder %v657_v24, 1 }
  0x53   : > { %1790 = vmatmul.mubr.f32.vlgmr.msra.gmra.mrb[16].mxu1 %v563_v41 }
  0x54   : > { %1792 = vmatprep.mubr.f32.mxu1 %v564_v42 }
  0x57   : > { %1793 = vmatmul.mubr.f32.gmra.mrb[18].mxu1 %v565_v43 }
 0x106   : > { %v1735_v6 = vpop.f32.mrb[0].mxu1 }
 0x107   : > { %v473_v7 = vadd.f32 %v1735_v6, %v2235_v5  ;;  %v467_v8 = vpop.f32.mrb[1].mxu1 }
 0x108   : > { %v468_v9 = vadd.f32 %v2235_v5, %v467_v8 }
 0x109   : > { %v547_v10 = vmax.f32 %v473_v7, 0.0 }
 0x10a   : > { %v546_v11 = vmax.f32 %v468_v9, 0.0  ;;  %v1738_v12 = vpop.f32.mrb[2].mxu1 }
 0x10b   : > { %694 = vst [vmem:[#allocation2 + $0x21] sm:$0xff] %v547_v10  ;;  %v483_v13 = vadd.f32 %v1738_v12, %v2235_v5  ;;  %v477_v14 = vpop.f32.mrb[3].mxu1  ;;  %v927_v30 = vmul.f32 %v2255_v18, %v547_v10  ;;  %v2279_v31 = vmul.f32 %v2250_v17, %v547_v10 }
 0x10c   : > { %693 = vst [vmem:[#allocation2 + $0x19] sm:$0xff] %v546_v11  ;;  %v478_v15 = vadd.f32 %v2235_v5, %v477_v14  ;;  %v926_v28 = vmul.f32 %v2255_v18, %v546_v11  ;;  %v769_v35 = vmul.f32 %v2250_v17, %v546_v11 }
 0x10d   : > { %v549_v16 = vmax.f32 %v483_v13, 0.0 }
 0x10e   : > { %v548_v19 = vmax.f32 %v478_v15, 0.0  ;;  %v1741_v20 = vpop.f32.mrb[4].mxu1 }
 0x10f   : > { %696 = vst [vmem:[#allocation2 + $0x39] sm:$0xff] %v549_v16  ;;  %v493_v22 = vadd.f32 %v1741_v20, %v2235_v5  ;;  %v487_v23 = vpop.f32.mrb[5].mxu1  ;;  %v2289_v34 = vmul.f32 %v2260_v21, %v549_v16  ;;  %v2293_v36 = vmul.f32 %v2255_v18, %v549_v16  ;;  %v2305_v43 = vmul.f32 %v2250_v17, %v549_v16 }
 0x110   : > { %695 = vst [vmem:[#allocation2 + $0x31] sm:$0xff] %v548_v19  ;;  %v488_v26 = vadd.f32 %v2235_v5, %v487_v23  ;;  %v1118_v40 = vmul.f32 %v2260_v21, %v548_v19  ;;  %v928_v42 = vmul.f32 %v2255_v18, %v548_v19  ;;  %v2312_v51 = vmul.f32 %v2250_v17, %v548_v19 }
 0x111   : > { %v2281_v32 = vmax.f32 %v493_v22, 0.0 }
 0x112   : > { %v2295_v37 = vmax.f32 %v488_v26, 0.0  ;;  %v1744_v38 = vpop.f32.mrb[6].mxu1  ;;  %v959_v41 = vld [vmem:[#allocation2 + $0x22] sm:$0xff] }
 0x113   : > { %698 = vst [vmem:[#allocation2 + $0x51] sm:$0xff] %v2281_v32  ;;  %v503_v44 = vadd.f32 %v1744_v38, %v2235_v5  ;;  %v497_v45 = vpop.f32.mrb[7].mxu1  ;;  %v868_v46 = vld [vmem:[#allocation2 + $0x18] sm:$0xff]  ;;  %v869_v48 = vld [vmem:[#allocation2 + $0x20] sm:$0xff]  ;;  %v980_v49 = vmul.f32 %v2275_v29, %v959_v41  ;;  %v823_v50 = vmul.f32 %v2269_v27, %v959_v41  ;;  %v2325_v56 = vmul.f32 %v2260_v21, %v2281_v32 }
 0x114   : > { %v958_v47 = vld [vmem:[#allocation2 + $0x1a] sm:$0xff]  ;;  %697 = vst [vmem:[#allocation2 + $0x49] sm:$0xff] %v2295_v37  ;;  %v498_v52 = vadd.f32 %v2235_v5, %v497_v45  ;;  %v889_v53 = vmul.f32 %v2286_v33, %v868_v46  ;;  %v890_v55 = vmul.f32 %v2286_v33, %v869_v48  ;;  %v732_v60 = vmul.f32 %v2300_v39, %v868_v46 }
 0x115   : > { %v2327_v57 = vmax.f32 %v503_v44, 0.0  ;;  %v979_v58 = vmul.f32 %v2275_v29, %v958_v47  ;;  %v822_v61 = vmul.f32 %v2269_v27, %v958_v47  ;;  %v1120_v3 = vmul.f32 %v2260_v21, %v2295_v37 }
 0x116   : > { %v2337_v62 = vmax.f32 %v498_v52, 0.0  ;;  %v1747_v63 = vpop.f32.mrb[8].mxu1  ;;  %v942_v0 = vadd.f32 %v926_v28, %v889_v53  ;;  %v943_v1 = vadd.f32 %v927_v30, %v890_v55  ;;  %v2339_v2 = vld [vmem:[#allocation2 + $0x3a] sm:$0xff]  ;;  %v785_v11 = vadd.f32 %v769_v35, %v732_v60 }
 0x117   : > { %700 = vst [vmem:[#allocation2 + $0x69] sm:$0xff] %v2327_v57  ;;  %v513_v4 = vadd.f32 %v1747_v63, %v2235_v5  ;;  %v507_v6 = vpop.f32.mrb[9].mxu1  ;;  %v1060_v7 = vld [vmem:[#allocation2 + $0x30] sm:$0xff]  ;;  %v2345_v9 = vld [vmem:[#allocation2 + $0x38] sm:$0xff]  ;;  %v2349_v10 = vmul.f32 %v2320_v54, %v2339_v2  ;;  %v733_v12 = vmul.f32 %v2300_v39, %v869_v48  ;;  %v982_v16 = vmul.f32 %v2275_v29, %v2339_v2 }
 0x118   : > { %v1150_v8 = vld [vmem:[#allocation2 + $0x32] sm:$0xff]  ;;  %699 = vst [vmem:[#allocation2 + $0x61] sm:$0xff] %v2337_v62  ;;  %v508_v13 = vadd.f32 %v2235_v5, %v507_v6  ;;  %v2354_v14 = vadd.f32 %v979_v58, %v942_v0  ;;  %v1081_v15 = vmul.f32 %v2333_v59, %v1060_v7  ;;  %v2362_v22 = vadd.f32 %v980_v49, %v943_v1 }
 0x119   : > { %v2359_v19 = vmax.f32 %v513_v4, 0.0  ;;  %v1171_v20 = vmul.f32 %v2320_v54, %v1150_v8  ;;  %v1082_v23 = vmul.f32 %v2333_v59, %v2345_v9  ;;  %v838_v35 = vadd.f32 %v822_v61, %v785_v11 }
 0x11a   : > { %v2366_v26 = vmax.f32 %v508_v13, 0.0  ;;  %v1750_v28 = vpop.f32.mrb[10].mxu1  ;;  %v1134_v30 = vadd.f32 %v1118_v40, %v1081_v15  ;;  %v891_v38 = vmul.f32 %v2286_v33, %v1060_v7  ;;  %v981_v45 = vmul.f32 %v2275_v29, %v1150_v8  ;;  %v2388_v60 = vld [vmem:[#allocation2 + $0x52] sm:$0xff] }
 0x11b   : > { %702 = vst [vmem:[#allocation2 + $0x81] sm:$0xff] %v2359_v19  ;;  %v523_v41 = vadd.f32 %v1750_v28, %v2235_v5  ;;  %v517_v44 = vpop.f32.mrb[11].mxu1  ;;  %v2372_v46 = vld [vmem:[#allocation2 + $0x48] sm:$0xff]  ;;  %v786_v48 = vadd.f32 %v2279_v31, %v733_v12  ;;  %v892_v49 = vmul.f32 %v2286_v33, %v2345_v9  ;;  %v2382_v52 = vadd.f32 %v2289_v34, %v1082_v23  ;;  %v2386_v58 = vld [vmem:[#allocation2 + $0x50] sm:$0xff] }
 0x11c   : > { %v2374_v47 = vld [vmem:[#allocation2 + $0x4a] sm:$0xff]  ;;  %701 = vst [vmem:[#allocation2 + $0x79] sm:$0xff] %v2366_v26  ;;  %v518_v40 = vadd.f32 %v2235_v5, %v517_v44  ;;  %v944_v53 = vadd.f32 %v928_v42, %v891_v38  ;;  %v1083_v55 = vmul.f32 %v2333_v59, %v2372_v46  ;;  %v2392_v31 = vadd.f32 %v1171_v20, %v1134_v30 }
 0x11d   : > { %v2390_v61 = vmax.f32 %v523_v41, 0.0  ;;  %v1173_v63 = vmul.f32 %v2320_v54, %v2374_v47  ;;  %v839_v0 = vadd.f32 %v823_v50, %v786_v48  ;;  %v945_v6 = vadd.f32 %v2293_v36, %v892_v49 }
 0x11e   : > { %v2396_v1 = vmax.f32 %v518_v40, 0.0  ;;  %v1753_v34 = vpop.f32.mrb[12].mxu1  ;;  %v997_v42 = vadd.f32 %v981_v45, %v944_v53  ;;  %v1136_v4 = vadd.f32 %v1120_v3, %v1083_v55  ;;  %v1084_v13 = vmul.f32 %v2333_v59, %v2386_v58 }
 0x11f   : > { %704 = vst [vmem:[#allocation2 + $0x99] sm:$0xff] %v2390_v61  ;;  %v533_v11 = vadd.f32 %v1753_v34, %v2235_v5  ;;  %v527_v12 = vpop.f32.mrb[13].mxu1  ;;  %v1174_v15 = vmul.f32 %v2320_v54, %v2388_v60  ;;  %v734_v50 = vmul.f32 %v2300_v39, %v1060_v7  ;;  %v998_v28 = vadd.f32 %v982_v16, %v945_v6  ;;  %v2419_v44 = vld [vmem:[#allocation2 + $0x60] sm:$0xff] }
 0x120   : > { %703 = vst [vmem:[#allocation2 + $0x91] sm:$0xff] %v2396_v1  ;;  %v528_v20 = vadd.f32 %v2235_v5, %v527_v12  ;;  %v1029_v3 = vadd.f32 %v997_v42, %v838_v35  ;;  %v1189_v23 = vadd.f32 %v1173_v63, %v1136_v4  ;;  %v1137_v38 = vadd.f32 %v2325_v56, %v1084_v13  ;;  %v2427_v35 = vld [vmem:[#allocation2 + $0x62] sm:$0xff] }
 0x121   : > { %v2414_v30 = vmax.f32 %v533_v11, 0.0  ;;  %v787_v41 = vadd.f32 %v2312_v51, %v734_v50  ;;  %v824_v7 = vmul.f32 %v2269_v27, %v1150_v8  ;;  %v1030_v49 = vadd.f32 %v998_v28, %v839_v0 }
 0x122   : > { %v2421_v45 = vmax.f32 %v528_v20, 0.0  ;;  %v1756_v24 = vpop.f32.mrb[14].mxu1  ;;  %v2423_v48 = vadd.f32 %v1189_v23, %v1029_v3  ;;  %v893_v16 = vmul.f32 %v2286_v33, %v2372_v46  ;;  %v1190_v8 = vadd.f32 %v1174_v15, %v1137_v38  ;;  %v2460_v3 = vld [vmem:[#allocation2 + $0x68] sm:$0xff] }
 0x123   : > { %706 = vst [vmem:[#allocation2 + $0xb1] sm:$0xff] %v2414_v30  ;;  %v2431_v51 = vadd.f32 %v1756_v24, %v2235_v5  ;;  %v537_v56 = vpop.f32.mrb[15].mxu1  ;;  %v840_v40 = vadd.f32 %v824_v7, %v787_v41  ;;  %v930_v53 = vmul.f32 %v2255_v18, %v2295_v37  ;;  %v983_v0 = vmul.f32 %v2275_v29, %v2374_v47 }
 0x124   : > { %705 = vst [vmem:[#allocation2 + $0xa9] sm:$0xff] %v2421_v45  ;;  %v538_v55 = vadd.f32 %v2235_v5, %v537_v56  ;;  %v1085_v34 = vmul.f32 %v2333_v59, %v2419_v44  ;;  %v1122_v42 = vmul.f32 %v2260_v21, %v2337_v62  ;;  %v2450_v6 = vadd.f32 %v1190_v8, %v1030_v49 }
 0x125   : > { %2772 = vst [vmem:[#allocation4_spill] sm:$0xff] %v2431_v51  ;;  %v2766_v4 = vmax.f32 %v2431_v51, 0.0  ;;  %v946_v11 = vadd.f32 %v930_v53, %v893_v16  ;;  %v1175_v25 = vmul.f32 %v2320_v54, %v2427_v35  ;;  %v735_v50 = vmul.f32 %v2300_v39, %v2345_v9 }
 0x126   : > { %v2454_v12 = vmax.f32 %v538_v55, 0.0  ;;  %v1791_v13 = vpop.f32.mrb[16].mxu1  ;;  %v1138_v15 = vadd.f32 %v1122_v42, %v1085_v34  ;;  %v825_v20 = vmul.f32 %v2269_v27, %v2339_v2  ;;  %v894_v41 = vmul.f32 %v2286_v33, %v2386_v58  ;;  %v2476_v55 = vld [vmem:[#allocation2 + $0x6a] sm:$0xff] }
 0x127   : > { %708 = vst [vmem:[#allocation2 + $0xc9] sm:$0xff] %v2766_v4  ;;  %v638_v23 = vadd.f32 %v1791_v13, %v2235_v5  ;;  %v632_v28 = vpop.f32.mrb[17].mxu1  ;;  %v999_v38 = vadd.f32 %v983_v0, %v946_v11  ;;  %v931_v7 = vmul.f32 %v2255_v18, %v2281_v32  ;;  %v788_v24 = vadd.f32 %v2305_v43, %v735_v50 }
 0x128   : > { %707 = vst [vmem:[#allocation2 + $0xc1] sm:$0xff] %v2454_v12  ;;  %v633_v9 = vadd.f32 %v2235_v5, %v632_v28  ;;  %v1191_v2 = vadd.f32 %v1175_v25, %v1138_v15  ;;  %v984_v49 = vmul.f32 %v2275_v29, %v2388_v60  ;;  %v1086_v53 = vmul.f32 %v2333_v59, %v2460_v3 }
 0x129   : > { %v652_v16 = vmax.f32 %v638_v23, 0.0  ;;  %v1031_v56 = vadd.f32 %v999_v38, %v840_v40  ;;  %v947_v8 = vadd.f32 %v931_v7, %v894_v41  ;;  %v2480_v42 = vadd.f32 %v2349_v10, %v2382_v52 }
 0x12a   : > { %v651_v0 = vmax.f32 %v633_v9, 0.0  ;;  %v1794_v34 = vpop.f32.mrb[18].mxu1  ;;  %v841_v11 = vadd.f32 %v825_v20, %v788_v24  ;;  %v1123_v43 = vmul.f32 %v2260_v21, %v2327_v57  ;;  %v1176_v20 = vmul.f32 %v2320_v54, %v2476_v55  ;;  %v2497_v9 = vld [vmem:[#allocation2 + $0x78] sm:$0xff] }
 0x12b   : > { %v660_v25 = vsel %vm2410_vm0, %v652_v16, 0.0  ;;  %v648_v40 = vadd.f32 %v1794_v34, %v2235_v5  ;;  %v642_v13 = vpop.f32.mrb[19].mxu1  ;;  %v2487_v15 = vadd.f32 %v1191_v2, %v1031_v56  ;;  %v1000_v50 = vadd.f32 %v984_v49, %v947_v8  ;;  %v2512_v8 = vld [vmem:[#allocation2 + $0x7a] sm:$0xff] }
 0x12c   : > { %688 = vst [vmem:[#allocation2 + $0x9] sm:$0xff] %v660_v25  ;;  %v659_v23 = vsel %vm2410_vm0, %v651_v0, 0.0  ;;  %v643_v10 = vadd.f32 %v2235_v5, %v642_v13  ;;  %v1139_v52 = vadd.f32 %v1123_v43, %v1086_v53  ;;  %v768_v38 = vmul.f32 %v2250_v17, %v660_v25  ;;  %v2530_v25 = vld [vmem:[#allocation2 + $0x80] sm:$0xff] }
 0x12d   : > { %687 = vst [vmem:[#allocation2 + $0x1] sm:$0xff] %v659_v23  ;;  %v654_v28 = vmax.f32 %v648_v40, 0.0  ;;  %v1032_v41 = vadd.f32 %v1000_v50, %v841_v11  ;;  %v736_v7 = vmul.f32 %v2300_v39, %v2372_v46  ;;  %v767_v36 = vmul.f32 %v2250_v17, %v659_v23 }
 0x12e   : > { %v653_v2 = vmax.f32 %v643_v10, 0.0  ;;  %v1192_v24 = vadd.f32 %v1176_v20, %v1139_v52  ;;  %v773_v5 = vmul.f32 %v2250_v17, %v2295_v37  ;;  %v826_v16 = vmul.f32 %v2269_v27, %v2374_v47 }
 0x12f   : > { %v2504_v49 = vsel %vm2439_vm1, %v654_v28, 0.0  ;;  %v895_v56 = vmul.f32 %v2286_v33, %v2419_v44  ;;  %v932_v46 = vmul.f32 %v2255_v18, %v2337_v62  ;;  %v1087_v47 = vmul.f32 %v2333_v59, %v2497_v9 }
 0x130   : > { %2775 = vst [vmem:[#allocation5_spill] sm:$0xff] %v2504_v49  ;;  %691 = vst [vmem:[#allocation2 + $0xe1] sm:$0xff] %v2504_v49  ;;  %v2517_v37 = vsel %vm2439_vm1, %v653_v2, 0.0  ;;  %v2519_v53 = vadd.f32 %v1192_v24, %v1032_v41  ;;  %v789_v0 = vadd.f32 %v773_v5, %v736_v7  ;;  %v985_v11 = vmul.f32 %v2275_v29, %v2427_v35  ;;  %v2542_v41 = vld [vmem:[#allocation2 + $0x82] sm:$0xff] }
 0x131   : > { %2776 = vst [vmem:[#allocation6_spill] sm:$0xff] %v2517_v37  ;;  %690 = vst [vmem:[#allocation2 + $0xd9] sm:$0xff] %v2517_v37  ;;  %v948_v34 = vadd.f32 %v932_v46, %v895_v56  ;;  %v1124_v43 = vmul.f32 %v2260_v21, %v2366_v26  ;;  %v737_v63 = vmul.f32 %v2300_v39, %v2386_v58 }
 0x132   : > { %v842_v40 = vadd.f32 %v826_v16, %v789_v0  ;;  %v1177_v13 = vmul.f32 %v2320_v54, %v2512_v8  ;;  %v774_v50 = vmul.f32 %v2250_v17, %v2281_v32  ;;  %v896_v23 = vmul.f32 %v2286_v33, %v2460_v3 }
 0x133   : > { %v800_v10 = vld [vmem:[#allocation2 + $0xa] sm:$0xff]  ;;  %v1001_v52 = vadd.f32 %v985_v11, %v948_v34  ;;  %v1140_v20 = vadd.f32 %v1124_v43, %v1087_v47  ;;  %v827_v28 = vmul.f32 %v2269_v27, %v2388_v60  ;;  %v933_v58 = vmul.f32 %v2255_v18, %v2327_v57 }
 0x134   : > { %v709_v7 = vld [vmem:[#allocation2] sm:$0xff]  ;;  %v710_v24 = vld [vmem:[#allocation2 + $0x8] sm:$0xff]  ;;  %v790_v5 = vadd.f32 %v774_v50, %v737_v63  ;;  %v986_v32 = vmul.f32 %v2275_v29, %v2476_v55  ;;  %v1088_v16 = vmul.f32 %v2333_v59, %v2530_v25  ;;  %v1125_v56 = vmul.f32 %v2260_v21, %v2359_v19 }
 0x135   : > { %v799_v2 = vld [vmem:[#allocation2 + $0x2] sm:$0xff]  ;;  %v730_v60 = vmul.f32 %v2300_v39, %v709_v7  ;;  %v731_v46 = vmul.f32 %v2300_v39, %v710_v24  ;;  %v821_v0 = vmul.f32 %v2269_v27, %v800_v10  ;;  %v1033_v47 = vadd.f32 %v1001_v52, %v842_v40  ;;  %v2562_v10 = vld [vmem:[#allocation2 + $0x90] sm:$0xff] }
 0x136   : > { %v820_v34 = vmul.f32 %v2269_v27, %v799_v2  ;;  %v1193_v11 = vadd.f32 %v1177_v13, %v1140_v20  ;;  %v949_v43 = vadd.f32 %v933_v58, %v896_v23  ;;  %v1141_v63 = vadd.f32 %v1125_v56, %v1088_v16  ;;  %v2584_v16 = vld [vmem:[#allocation2 + $0x98] sm:$0xff] }
 0x137   : > { %v783_v50 = vadd.f32 %v767_v36, %v730_v60  ;;  %v784_v4 = vadd.f32 %v768_v38, %v731_v46  ;;  %v1178_v49 = vmul.f32 %v2320_v54, %v2542_v41  ;;  %v738_v37 = vmul.f32 %v2300_v39, %v2419_v44  ;;  %v2566_v36 = vld [vmem:[#allocation2 + $0x92] sm:$0xff] }
 0x138   : > { %v2558_v51 = vadd.f32 %v1193_v11, %v1033_v47  ;;  %v843_v7 = vadd.f32 %v827_v28, %v790_v5  ;;  %v1002_v24 = vadd.f32 %v986_v32, %v949_v43  ;;  %v775_v40 = vmul.f32 %v2250_v17, %v2337_v62  ;;  %v2594_v11 = vld [vmem:[#allocation2 + $0x9a] sm:$0xff] }
 0x139   : > { %v836_v13 = vadd.f32 %v820_v34, %v783_v50  ;;  %v837_v23 = vadd.f32 %v821_v0, %v784_v4  ;;  %v1194_v52 = vadd.f32 %v1178_v49, %v1141_v63  ;;  %v897_v38 = vmul.f32 %v2286_v33, %v2497_v9 }
 0x13a   : > { %v1034_v20 = vadd.f32 %v1002_v24, %v843_v7  ;;  %v791_v58 = vadd.f32 %v775_v40, %v738_v37  ;;  %v828_v44 = vmul.f32 %v2269_v27, %v2427_v35  ;;  %v934_v28 = vmul.f32 %v2255_v18, %v2366_v26 }
 0x13b   : > { %v1027_v62 = vadd.f32 %v2354_v14, %v836_v13  ;;  %v1028_v2 = vadd.f32 %v2362_v22, %v837_v23  ;;  %v1089_v4 = vmul.f32 %v2333_v59, %v2562_v10  ;;  %v1126_v49 = vmul.f32 %v2260_v21, %v2396_v1  ;;  %v2613_v23 = vld [vmem:[#allocation2 + $0xa8] sm:$0xff] }
 0x13c   : > { %v2578_v5 = vadd.f32 %v1194_v52, %v1034_v20  ;;  %v950_v32 = vadd.f32 %v934_v28, %v897_v38  ;;  %v987_v37 = vmul.f32 %v2275_v29, %v2512_v8  ;;  %v1179_v35 = vmul.f32 %v2320_v54, %v2566_v36 }
 0x13d   : > { %v1219_v14 = vadd.f32 %v2392_v31, %v1027_v62  ;;  %v1220_v22 = vadd.f32 %v2480_v42, %v1028_v2  ;;  %v1142_v56 = vadd.f32 %v1126_v49, %v1089_v4  ;;  %v739_v60 = vmul.f32 %v2300_v39, %v2460_v3 }
 0x13e   : > { %v844_v46 = vadd.f32 %v828_v44, %v791_v58  ;;  %v1003_v0 = vadd.f32 %v987_v37, %v950_v32  ;;  %v776_v47 = vmul.f32 %v2250_v17, %v2327_v57  ;;  %v898_v34 = vmul.f32 %v2286_v33, %v2530_v25  ;;  %v2619_v58 = vld [vmem:[#allocation2 + $0xaa] sm:$0xff] }
 0x13f   : > { %1827 = vmatprep.mubr.f32.mxu0 %v1219_v14  ;;  %v1195_v43 = vadd.f32 %v1179_v35, %v1142_v56  ;;  %v829_v31 = vmul.f32 %v2269_v27, %v2476_v55  ;;  %v935_v42 = vmul.f32 %v2255_v18, %v2359_v19  ;;  %v1090_v3 = vmul.f32 %v2333_v59, %v2584_v16  ;;  %v2635_v35 = vld [vmem:[#allocation2 + $0xb0] sm:$0xff] }
 0x140   : > { %1828 = vmatmul.mubr.f32.vlgmr.msra.gmra.mrb[0].mxu0 %v1220_v22  ;;  %v1035_v63 = vadd.f32 %v1003_v0, %v844_v46  ;;  %v792_v50 = vadd.f32 %v776_v47, %v739_v60  ;;  %v988_v57 = vmul.f32 %v2275_v29, %v2542_v41  ;;  %v1127_v7 = vmul.f32 %v2260_v21, %v2390_v61 }
 0x141   : > { %1830 = vmatprep.mubr.f32.mxu0 %v2423_v48  ;;  %v951_v24 = vadd.f32 %v935_v42, %v898_v34  ;;  %v1180_v55 = vmul.f32 %v2320_v54, %v2594_v11  ;;  %v740_v40 = vmul.f32 %v2300_v39, %v2497_v9  ;;  %v777_v13 = vmul.f32 %v2250_v17, %v2366_v26  ;;  %v2645_v34 = vld [vmem:[#allocation2 + $0xb2] sm:$0xff] }
 0x142   : > { %v1227_v52 = vadd.f32 %v1195_v43, %v1035_v63  ;;  %v1143_v38 = vadd.f32 %v1127_v7, %v1090_v3  ;;  %v830_v20 = vmul.f32 %v2269_v27, %v2512_v8  ;;  %v899_v48 = vmul.f32 %v2286_v33, %v2562_v10 }
 0x143   : > { %v845_v44 = vadd.f32 %v829_v31, %v792_v50  ;;  %v1004_v28 = vadd.f32 %v988_v57, %v951_v24  ;;  %v793_v62 = vadd.f32 %v777_v13, %v740_v40  ;;  %v936_v9 = vmul.f32 %v2255_v18, %v2396_v1  ;;  %v1072_v50 = vld [vmem:[#allocation2 + $0xc0] sm:$0xff] }
 0x144   : > { %1831 = vmatmul.mubr.f32.gmra.mrb[2].mxu0 %v2450_v6  ;;  %v1196_v26 = vadd.f32 %v1180_v55, %v1143_v38  ;;  %v989_v2 = vmul.f32 %v2275_v29, %v2566_v36  ;;  %v1091_v8 = vmul.f32 %v2333_v59, %v2613_v23  ;;  %v1128_v4 = vmul.f32 %v2260_v21, %v2421_v45  ;;  %v1162_v38 = vld [vmem:[#allocation2 + $0xc2] sm:$0xff] }
 0x145   : > { %1833 = vmatprep.mubr.f32.mxu0 %v2487_v15  ;;  %v1036_v49 = vadd.f32 %v1004_v28, %v845_v44  ;;  %v952_v32 = vadd.f32 %v936_v9, %v899_v48  ;;  %v1181_v37 = vmul.f32 %v2320_v54, %v2619_v58  ;;  %v741_v6 = vmul.f32 %v2300_v39, %v2530_v25 }
 0x146   : > { %v846_v14 = vadd.f32 %v830_v20, %v793_v62  ;;  %v1144_v22 = vadd.f32 %v1128_v4, %v1091_v8  ;;  %v778_v56 = vmul.f32 %v2250_v17, %v2359_v19  ;;  %v900_v60 = vmul.f32 %v2286_v33, %v2584_v16 }
 0x147   : > { %v1228_v46 = vadd.f32 %v1196_v26, %v1036_v49  ;;  %v1005_v15 = vadd.f32 %v989_v2, %v952_v32  ;;  %v831_v0 = vmul.f32 %v2269_v27, %v2542_v41  ;;  %v937_v47 = vmul.f32 %v2255_v18, %v2390_v61  ;;  %v1073_v26 = vld [vmem:[#allocation2 + $0xc8] sm:$0xff] }
 0x148   : > { %1834 = vmatmul.mubr.f32.gmra.mrb[4].mxu0 %v2519_v53  ;;  %v1197_v25 = vadd.f32 %v1181_v37, %v1144_v22  ;;  %v794_v43 = vadd.f32 %v778_v56, %v741_v6  ;;  %v1092_v19 = vmul.f32 %v2333_v59, %v2635_v35  ;;  %v1129_v31 = vmul.f32 %v2260_v21, %v2414_v30  ;;  %v1163_v37 = vld [vmem:[#allocation2 + $0xca] sm:$0xff] }
 0x149   : > { %1836 = vmatprep.mubr.f32.mxu0 %v2558_v51  ;;  %v1037_v42 = vadd.f32 %v1005_v15, %v846_v14  ;;  %v953_v3 = vadd.f32 %v937_v47, %v900_v60  ;;  %v990_v41 = vmul.f32 %v2275_v29, %v2594_v11  ;;  %v742_v63 = vmul.f32 %v2300_v39, %v2562_v10  ;;  %v2777_v15 = vld [vmem:[#allocation4_spill] sm:$0xff] }
 0x14a   : > { %v847_v53 = vadd.f32 %v831_v0, %v794_v43  ;;  %v1145_v57 = vadd.f32 %v1129_v31, %v1092_v19  ;;  %v1182_v7 = vmul.f32 %v2320_v54, %v2645_v34  ;;  %v779_v24 = vmul.f32 %v2250_v17, %v2396_v1  ;;  %v1074_v43 = vld [vmem:[#allocation2 + $0xd8] sm:$0xff] }
 0x14b   : > { %v1229_v55 = vadd.f32 %v1197_v25, %v1037_v42  ;;  %v1006_v40 = vadd.f32 %v990_v41, %v953_v3  ;;  %v901_v51 = vmul.f32 %v2286_v33, %v2613_v23  ;;  %v938_v13 = vmul.f32 %v2255_v18, %v2421_v45  ;;  %v1164_v19 = vld [vmem:[#allocation2 + $0xda] sm:$0xff] }
 0x14c   : > { %1837 = vmatmul.mubr.f32.gmra.mrb[6].mxu0 %v2578_v5  ;;  %v1198_v10 = vadd.f32 %v1182_v7, %v1145_v57  ;;  %v795_v20 = vadd.f32 %v779_v24, %v742_v63  ;;  %v832_v48 = vmul.f32 %v2269_v27, %v2566_v36  ;;  %v1093_v44 = vmul.f32 %v2333_v59, %v1072_v50 }
 0x14d   : > { %1839 = vmatprep.mubr.f32.mxu0 %v1227_v52  ;;  %v1038_v1 = vadd.f32 %v1006_v40, %v847_v53  ;;  %v954_v28 = vadd.f32 %v938_v13, %v901_v51  ;;  %v991_v62 = vmul.f32 %v2275_v29, %v2619_v58  ;;  %v1130_v9 = vmul.f32 %v2260_v21, %v2454_v12 }
 0x14e   : > { %v848_v2 = vadd.f32 %v832_v48, %v795_v20  ;;  %v1183_v5 = vmul.f32 %v2320_v54, %v1162_v38  ;;  %v743_v8 = vmul.f32 %v2300_v39, %v2584_v16  ;;  %v780_v36 = vmul.f32 %v2250_v17, %v2390_v61  ;;  %v1075_v48 = vld [vmem:[#allocation2 + $0xe0] sm:$0xff] }
 0x14f   : > { %v1230_v4 = vadd.f32 %v1198_v10, %v1038_v1  ;;  %v1007_v52 = vadd.f32 %v991_v62, %v954_v28  ;;  %v1146_v49 = vadd.f32 %v1130_v9, %v1093_v44  ;;  %v902_v32 = vmul.f32 %v2286_v33, %v2635_v35  ;;  %v1165_v62 = vld [vmem:[#allocation2 + $0xe2] sm:$0xff] }
 0x150   : > { %1840 = vmatmul.mubr.f32.gmra.mrb[8].mxu0 %v1228_v46  ;;  %v796_v6 = vadd.f32 %v780_v36, %v743_v8  ;;  %v833_v14 = vmul.f32 %v2269_v27, %v2594_v11  ;;  %v939_v22 = vmul.f32 %v2255_v18, %v2414_v30  ;;  %v1094_v16 = vmul.f32 %v2333_v59, %v1073_v26 }
 0x151   : > { %1842 = vmatprep.mubr.f32.mxu0 %v1229_v55  ;;  %v1039_v56 = vadd.f32 %v1007_v52, %v848_v2  ;;  %v1199_v61 = vadd.f32 %v1183_v5, %v1146_v49  ;;  %v992_v60 = vmul.f32 %v2275_v29, %v2645_v34  ;;  %v2778_v0 = vmax.f32 %v2777_v15, 0.0  ;;  %v2779_v55 = vld [vmem:[#allocation6_spill] sm:$0xff] }
 0x152   : > { %v955_v46 = vadd.f32 %v939_v22, %v902_v32  ;;  %v1184_v25 = vmul.f32 %v2320_v54, %v1163_v37  ;;  %v744_v11 = vmul.f32 %v2300_v39, %v2613_v23  ;;  %v781_v30 = vmul.f32 %v2250_v17, %v2421_v45  ;;  %v761_v23 = vld [vmem:[#allocation2 + $0xb1] sm:$0xff] }
 0x153   : > { %v1131_v47 = vmul.f32 %v2260_v21, %v2778_v0  ;;  %v1231_v31 = vadd.f32 %v1199_v61, %v1039_v56  ;;  %v849_v42 = vadd.f32 %v833_v14, %v796_v6  ;;  %v903_v41 = vmul.f32 %v2286_v33, %v1072_v50  ;;  %v920_v50 = vld [vmem:[#allocation2 + $0xc9] sm:$0xff] }
 0x154   : > { %1843 = vmatmul.mubr.f32.gmra.mrb[10].mxu0 %v1230_v4  ;;  %v1008_v63 = vadd.f32 %v992_v60, %v955_v46  ;;  %v797_v53 = vadd.f32 %v781_v30, %v744_v11  ;;  %v834_v57 = vmul.f32 %v2269_v27, %v2619_v58  ;;  %v940_v7 = vmul.f32 %v2255_v18, %v2454_v12 }
 0x155   : > { %v1147_v3 = vadd.f32 %v1131_v47, %v1094_v16  ;;  %1845 = vmatprep.mubr.f32.mxu0 %v1231_v31  ;;  %v1095_v45 = vmul.f32 %v2333_v59, %v1074_v43  ;;  %v1132_v40 = vmul.f32 %v2260_v21, %v2779_v55  ;;  %v1185_v51 = vmul.f32 %v2320_v54, %v1164_v19 }
 0x156   : > { %v1040_v13 = vadd.f32 %v1008_v63, %v849_v42  ;;  %v956_v10 = vadd.f32 %v940_v7, %v903_v41  ;;  %v993_v20 = vmul.f32 %v2275_v29, %v1162_v38  ;;  %v745_v58 = vmul.f32 %v2300_v39, %v2635_v35  ;;  %v2780_v39 = vld [vmem:[#allocation5_spill] sm:$0xff] }
 0x157   : > { %v1200_v24 = vadd.f32 %v1184_v25, %v1147_v3  ;;  %v850_v12 = vadd.f32 %v834_v57, %v797_v53  ;;  %v1148_v44 = vadd.f32 %v1132_v40, %v1095_v45  ;;  %v782_v1 = vmul.f32 %v2250_v17, %v761_v23 }
 0x158   : > { %v904_v28 = vmul.f32 %v2286_v33, %v1073_v26  ;;  %v1009_v2 = vadd.f32 %v993_v20, %v956_v10  ;;  %v835_v5 = vmul.f32 %v2269_v27, %v2645_v34  ;;  %v941_v8 = vmul.f32 %v2255_v18, %v920_v50 }
 0x159   : > { %v1232_v9 = vadd.f32 %v1200_v24, %v1040_v13  ;;  %v1201_v36 = vadd.f32 %v1185_v51, %v1148_v44  ;;  %v798_v38 = vadd.f32 %v782_v1, %v745_v58  ;;  %v1096_v4 = vmul.f32 %v2333_v59, %v1075_v48 }
 0x15a   : > { %v1133_v35 = vmul.f32 %v2260_v21, %v2780_v39  ;;  %v1041_v52 = vadd.f32 %v1009_v2, %v850_v12  ;;  %v957_v17 = vadd.f32 %v941_v8, %v904_v28  ;;  %v994_v33 = vmul.f32 %v2275_v29, %v1163_v37  ;;  %v1614_v21 = vld [vmem:[%s2764_s6] ss:$0 sm:$0xff] }
 0x15b   : > { %1846 = vmatmul.mubr.f32.gmra.mrb[12].mxu0 %v1232_v9  ;;  %v1186_v26 = vmul.f32 %v2320_v54, %v1165_v62  ;;  %v851_v27 = vadd.f32 %v835_v5, %v798_v38 }
 0x15c   : > { %v1149_v49 = vadd.f32 %v1133_v35, %v1096_v4  ;;  %v1233_v32 = vadd.f32 %v1201_v36, %v1041_v52  ;;  %v1010_v34 = vadd.f32 %v994_v33, %v957_v17 }
 0x15e   : > { %v1202_v18 = vadd.f32 %v1186_v26, %v1149_v49  ;;  %1848 = vmatprep.mubr.f32.mxu0 %v1233_v32  ;;  %v1042_v6 = vadd.f32 %v1010_v34, %v851_v27 }
 0x160   : > { %v1234_v14 = vadd.f32 %v1202_v18, %v1042_v6 }
 0x162   : > { %1849 = vmatmul.mubr.f32.gmra.mrb[14].mxu0 %v1234_v14 }
 0x213   : > { %v1829_v59 = vpop.f32.mrb[0].mxu0 }
 0x214   : > { %v1362_v22 = vadd.f32 %v1829_v59, %v1614_v21  ;;  %v1356_v16 = vpop.f32.mrb[1].mxu0 }
 0x215   : > { %v1357_v29 = vadd.f32 %v1614_v21, %v1356_v16 }
 0x216   : > { %v1436_v54 = vmax.f32 %v1362_v22, 0.0 }
 0x217   : > { %v1435_v37 = vmax.f32 %v1357_v29, 0.0  ;;  %v1832_v56 = vpop.f32.mrb[2].mxu0 }
 0x218   : > { %1452 = vst [vmem:[%s2725_s23 + $0x8] sm:$0xff] %v1436_v54  ;;  %v1372_v61 = vadd.f32 %v1832_v56, %v1614_v21  ;;  %v1366_v60 = vpop.f32.mrb[3].mxu0 }
 0x219   : > { %1451 = vst [vmem:[%s2725_s23] sm:$0xff] %v1435_v37  ;;  %v1367_v15 = vadd.f32 %v1614_v21, %v1366_v60 }
 0x21a   : > { %v1438_v0 = vmax.f32 %v1372_v61, 0.0 }
 0x21b   : > { %v1437_v47 = vmax.f32 %v1367_v15, 0.0  ;;  %v1835_v46 = vpop.f32.mrb[4].mxu0 }
 0x21c   : > { %1454 = vst [vmem:[%s2725_s23 + $0x18] sm:$0xff] %v1438_v0  ;;  %v1382_v25 = vadd.f32 %v1835_v46, %v1614_v21  ;;  %v1376_v11 = vpop.f32.mrb[5].mxu0 }
 0x21d   : > { %1453 = vst [vmem:[%s2725_s23 + $0x10] sm:$0xff] %v1437_v47  ;;  %v1377_v30 = vadd.f32 %v1614_v21, %v1376_v11 }
 0x21e   : > { %v1440_v43 = vmax.f32 %v1382_v25, 0.0 }
 0x21f   : > { %v1439_v19 = vmax.f32 %v1377_v30, 0.0  ;;  %v1838_v31 = vpop.f32.mrb[6].mxu0 }
 0x220   : > { %1456 = vst [vmem:[%s2725_s23 + $0x28] sm:$0xff] %v1440_v43  ;;  %v1392_v42 = vadd.f32 %v1838_v31, %v1614_v21  ;;  %v1386_v3 = vpop.f32.mrb[7].mxu0 }
 0x221   : > { %1455 = vst [vmem:[%s2725_s23 + $0x20] sm:$0xff] %v1439_v19  ;;  %v1387_v41 = vadd.f32 %v1614_v21, %v1386_v3 }
 0x222   : > { %v1442_v63 = vmax.f32 %v1392_v42, 0.0 }
 0x223   : > { %v1441_v53 = vmax.f32 %v1387_v41, 0.0  ;;  %v1841_v57 = vpop.f32.mrb[8].mxu0 }
 0x224   : > { %1458 = vst [vmem:[%s2725_s23 + $0x38] sm:$0xff] %v1442_v63  ;;  %v1402_v7 = vadd.f32 %v1841_v57, %v1614_v21  ;;  %v1396_v23 = vpop.f32.mrb[9].mxu0 }
 0x225   : > { %1457 = vst [vmem:[%s2725_s23 + $0x30] sm:$0xff] %v1441_v53  ;;  %v1397_v24 = vadd.f32 %v1614_v21, %v1396_v23 }
 0x226   : > { %v1444_v45 = vmax.f32 %v1402_v7, 0.0 }
 0x227   : > { %v1443_v55 = vmax.f32 %v1397_v24, 0.0  ;;  %v1844_v40 = vpop.f32.mrb[10].mxu0 }
 0x228   : > { %1460 = vst [vmem:[%s2725_s23 + $0x48] sm:$0xff] %v1444_v45  ;;  %v1412_v51 = vadd.f32 %v1844_v40, %v1614_v21  ;;  %v1406_v50 = vpop.f32.mrb[11].mxu0 }
 0x229   : > { %1459 = vst [vmem:[%s2725_s23 + $0x40] sm:$0xff] %v1443_v55  ;;  %v1407_v13 = vadd.f32 %v1614_v21, %v1406_v50 }
 0x22a   : > { %v1446_v10 = vmax.f32 %v1412_v51, 0.0 }
 0x22b   : > { %v1445_v20 = vmax.f32 %v1407_v13, 0.0 }
 0x22c   : > { %1462 = vst [vmem:[%s2725_s23 + $0x58] sm:$0xff] %v1446_v10 }
 0x22d   : > { %1461 = vst [vmem:[%s2725_s23 + $0x50] sm:$0xff] %v1445_v20 }
 0x22e   : > { %v1847_v58 = vpop.f32.mrb[12].mxu0 }
 0x22f   : > { %v1422_v48 = vadd.f32 %v1847_v58, %v1614_v21  ;;  %v1416_v12 = vpop.f32.mrb[13].mxu0 }
 0x230   : > { %v1417_v44 = vadd.f32 %v1614_v21, %v1416_v12 }
 0x231   : > { %v1448_v1 = vmax.f32 %v1422_v48, 0.0 }
 0x232   : > { %v1447_v28 = vmax.f32 %v1417_v44, 0.0 }
 0x233   : > { %1464 = vst [vmem:[%s2725_s23 + $0x68] sm:$0xff] %v1448_v1 }
 0x234   : > { %1463 = vst [vmem:[%s2725_s23 + $0x60] sm:$0xff] %v1447_v28 }
 0x235   : > { %v1850_v62 = vpop.f32.mrb[14].mxu0 }
 0x236   : > { %v1432_v9 = vadd.f32 %v1850_v62, %v1614_v21  ;;  %v1426_v2 = vpop.f32.mrb[15].mxu0 }
 0x237   : > { %v1427_v5 = vadd.f32 %v1614_v21, %v1426_v2 }
 0x238   : > { %v1450_v8 = vmax.f32 %v1432_v9, 0.0 }
 0x239   : > { %v1449_v36 = vmax.f32 %v1427_v5, 0.0 }
 0x23a   : > { %1466 = vst [vmem:[%s2725_s23 + $0x78] sm:$0xff] %v1450_v8 }
 0x23b   : > { %1465 = vst [vmem:[%s2725_s23 + $0x70] sm:$0xff] %v1449_v36 }
 0x23c PF: > { %s17_s28 = sadd.s32 1, %s2026_s28   ;;  %s2781_s24 = smov %s2018_s26 }
 0x23d   : > { %p14_p10 = scmp.ge.s32.totalorder %s17_s28, 6   ;;  %s2782_s25 = smov %s2022_s27 }
 0x23e   : > { %s2783_s26 = smov %s2786_s29  ;;  %s2784_s27 = smov %s2790_s30 }
 0x23f   :  { %16 = sbr.rel (!%p14_p10) target bundleno = 3 (0x3), region = 84 }

</bundles_post_ra>
